<compile_context>
chip_gen: v6e
topology: v6e:2x2x1
jax: 0.10.0
libtpu: 0.0.40
codegen_flags: <defaults>
</compile_context>

<pallas_src>
import jax
import jax.numpy as jnp
from jax.experimental import pallas as pl
from jax.experimental.pallas import tpu as pltpu

LANES = 128           # lane width of a vreg
TILE_ROWS = 2048      # 2048 x 128 f32 = 1 MiB per tile buffer (~4 MiB live, dbl-buffered)


def _round_up(a: int, m: int) -> int:
    return ((a + m - 1) // m) * m


def linear_kernel(w_ref, b_ref, x_ref, o_ref):
    # y = x * w + b.  Scalars come from SMEM once per tile; the multiply-add
    # is one VPU op per vreg and is completely hidden under the HBM DMA.
    o_ref[...] = x_ref[...] * w_ref[0] + b_ref[0]


def simple_linear(x, weight, bias, *, min_pallas_batch: int = 8 * LANES):
    """Pallas equivalent of torch.nn.Linear(1, 1).forward(x).

    x:      (B, 1) float32
    weight: (1, 1) float32   (torch parameter shape)
    bias:   (1,)   float32
    """
    B, _ = x.shape
    dtype = x.dtype
    w1 = weight.reshape(1)   # 1-D SMEM (avoid 2-D SMEM padding to [8,128])
    b1 = bias.reshape(1)

    if B < min_pallas_batch:
        # Tiny batches: pallas_call fixed launch cost dominates -> plain XLA FMA.
        return x * w1[0] + b1[0]

    # --- lane-dense layout: flatten batch onto (rows, 128) ---------------------
    rows_needed = pl.cdiv(B, LANES)
    padded_rows = _round_up(rows_needed, 8)      # sublane-aligned only (NOT tile-aligned)
    padded_elems = padded_rows * LANES

    # Tile choice: as large as possible to amortize per-step overhead, but capped
    # so the grid has >= 2 steps (lets v7x's 2 TensorCores split the stream).
    half_rows = _round_up(pl.cdiv(padded_rows, 2), 8)
    tile_rows = max(8, min(TILE_ROWS, half_rows))
    n_tiles = pl.cdiv(padded_rows, tile_rows)    # last block may be ragged (masked store)

    x2 = x.reshape(-1)
    if padded_elems != B:
        # Only the unaligned case pays for a pad (and allow_input_fusion lets XLA
        # try to fold it into the kernel's input pipeline instead of a full HBM pass).
        x2 = jnp.pad(x2, (0, padded_elems - B))
    x2 = x2.reshape(padded_rows, LANES)

    out2 = pl.pallas_call(
        linear_kernel,
        out_shape=jax.ShapeDtypeStruct((padded_rows, LANES), dtype),
        grid=(n_tiles,),
        in_specs=[
            pl.BlockSpec(memory_space=pltpu.MemorySpace.SMEM),   # weight (1,)
            pl.BlockSpec(memory_space=pltpu.MemorySpace.SMEM),   # bias   (1,)
            pl.BlockSpec((tile_rows, LANES), lambda i: (i, 0)),  # x slab tile
        ],
        out_specs=pl.BlockSpec((tile_rows, LANES), lambda i: (i, 0)),
        compiler_params=pltpu.CompilerParams(
            dimension_semantics=("parallel",),       # megacore sharding on v7x
            vmem_limit_bytes=32 * 1024 * 1024,       # headroom for 1 MiB tiles, all chips
            allow_input_fusion=[False, False, True],  # let pad/reshape fuse into x operand
        ),
    )(w1, b1, x2)

    if padded_elems == B:
        # Aligned batch: pure (free) reshape, no extra HBM pass.
        return out2.reshape(B, 1)
    # Unaligned batch: drop the padded tail and restore the torch-style shape.
    return out2.reshape(-1)[:B].reshape(B, 1)


if __name__ == "__main__":
    key = jax.random.PRNGKey(0)
    kx, kw, kb, kx2, kx3 = jax.random.split(key, 5)

    # Deterministic parameter init mirroring torch's U(-1/sqrt(fan_in), ...)
    # with fan_in = 1  ->  U(-1, 1).
    weight = jax.random.uniform(kw, (1, 1), dtype=jnp.float32, minval=-1.0, maxval=1.0)
    bias = jax.random.uniform(kb, (1,), dtype=jnp.float32, minval=-1.0, maxval=1.0)

    def ref(x):
        return x @ weight.T + bias

    # 1) Tiny batch consistent with Linear(1, 1) -- exercises the XLA fallback path.
    x_small = jax.random.normal(kx, (8, 1), dtype=jnp.float32)
    out_small = jax.block_until_ready(simple_linear(x_small, weight, bias))
    assert out_small.shape == (8, 1) and out_small.dtype == jnp.float32
    assert jnp.allclose(out_small, ref(x_small), atol=1e-6), "mismatch (small batch)"

    # 2) Aligned batch (multiple of 8*128): no pad, no output slice, 2 exact tiles.
    B_aligned = 2 * TILE_ROWS * LANES
    x_al = jax.random.normal(kx2, (B_aligned, 1), dtype=jnp.float32)
    out_al = jax.block_until_ready(simple_linear(x_al, weight, bias))
    assert out_al.shape == (B_aligned, 1)
    assert jnp.allclose(out_al, ref(x_al), atol=1e-6), "mismatch (aligned batch)"

    # 3) Unaligned batch, not a multiple of tile_rows*128: exercises the pad path
    #    AND a ragged last grid block (out-of-bounds rows masked on store).
    B_rag = (2 * TILE_ROWS + 512) * LANES + 77
    x_rag = jax.random.normal(kx3, (B_rag, 1), dtype=jnp.float32)
    out_rag = jax.block_until_ready(simple_linear(x_rag, weight, bias))
    assert out_rag.shape == (B_rag, 1)
    assert jnp.allclose(out_rag, ref(x_rag), atol=1e-6), "mismatch (ragged batch)"

    print("KERNEL_OK")
</pallas_src>

<mosaic_0001>
module attributes {stable_mosaic.version = 11 : i64} {
  func.func @linear_kernel(%arg0: i32, %arg1: memref<1xf32, #tpu.memory_space<smem>>, %arg2: memref<1xf32, #tpu.memory_space<smem>>, %arg3: memref<2048x128xf32, #tpu.memory_space<vmem>>, %arg4: memref<2048x128xf32, #tpu.memory_space<vmem>>) attributes {dimension_semantics = [#tpu.dimension_semantics<parallel>], iteration_bounds = array<i64: 2>, scalar_prefetch = 0 : i64, scratch_operands = 0 : i64, tpu.core_type = #tpu.core_type<tc>, window_params = [{transform_indices = @transform_0, window_bounds = array<i64: 1>}, {transform_indices = @transform_1, window_bounds = array<i64: 1>}, {transform_indices = @transform_2, window_bounds = array<i64: 2048, 128>}, {transform_indices = @transform_3, window_bounds = array<i64: 2048, 128>}]} {
    %c0 = arith.constant 0 : index
    %c0_0 = arith.constant 0 : index
    %0 = vector.load %arg3[%c0, %c0_0] : memref<2048x128xf32, #tpu.memory_space<vmem>>, vector<2048x128xf32>
    %c0_1 = arith.constant 0 : index
    %1 = memref.load %arg1[%c0_1] : memref<1xf32, #tpu.memory_space<smem>>
    %2 = vector.broadcast %1 : f32 to vector<2048x128xf32>
    %3 = arith.mulf %0, %2 : vector<2048x128xf32>
    %c0_2 = arith.constant 0 : index
    %4 = memref.load %arg2[%c0_2] : memref<1xf32, #tpu.memory_space<smem>>
    %5 = vector.broadcast %4 : f32 to vector<2048x128xf32>
    %6 = arith.addf %3, %5 : vector<2048x128xf32>
    %c0_3 = arith.constant 0 : index
    %c0_4 = arith.constant 0 : index
    %7 = vector.load %arg4[%c0_3, %c0_4] : memref<2048x128xf32, #tpu.memory_space<vmem>>, vector<2048x128xf32>
    tpu.vector_store %arg4[%c0_3, %c0_4], %6 {strides = array<i32>} : memref<2048x128xf32, #tpu.memory_space<vmem>>, vector<2048x128xf32>,
    return
  }
  func.func @transform_0(%arg0: i32) -> i32 {
    %c0_i32 = arith.constant 0 : i32
    %c0_i32_0 = arith.constant 0 : i32
    return %c0_i32 : i32
  }
  func.func @transform_1(%arg0: i32) -> i32 {
    %c0_i32 = arith.constant 0 : i32
    %c0_i32_0 = arith.constant 0 : i32
    return %c0_i32 : i32
  }
  func.func @transform_2(%arg0: i32) -> (i32, i32) {
    %c0_i32 = arith.constant 0 : i32
    %c0_i32_0 = arith.constant 0 : i32
    return %arg0, %c0_i32 : i32, i32
  }
  func.func @transform_3(%arg0: i32) -> (i32, i32) {
    %c0_i32 = arith.constant 0 : i32
    %c0_i32_0 = arith.constant 0 : i32
    return %arg0, %c0_i32 : i32, i32
  }
}

</mosaic_0001>

<bundles_post_ra>
// kernel: tpu_custom_call.1
= control target key start
LH: loop header
LB: loop body
LE: loop exit
PB: predicated region body
PF: predicated region fallthrough
CT: control target
= control target key end

     0   :  { %s2691_s0 = inlined_call_operand.<no memory space> [shape: f32[1], index: 0, kind: input, shape index: {}]   ;;  %s2692_s1 = inlined_call_operand.<no memory space> [shape: f32[1], index: 1, kind: input, shape index: {}]   ;;  %s2693_s2 = inlined_call_operand.hbm [shape: f32[4096,128], index: 2, kind: input, shape index: {}]   ;;  %s2694_s3 = inlined_call_operand.hbm [shape: f32[4096,128], index: 3, kind: output, shape index: {}]  }
   0x1   :  { %8 = sst [smem:[#allocation2]] %s2691_s0 }
   0x2   :  { %9 = sst [smem:[#allocation3]] %s2692_s1 }
   0x3   :  { %10 = vsyncpa [#allocation5], 0 }
   0x4   :  { %12 = vsyncpa [#allocation5 + $0x1], 0 }
   0x5   :  { %13 = vsyncpa [#allocation6], 0 }
   0x6   :  { %15 = vsyncpa [#allocation6 + $0x1], 0  ;;  %s1500_s16 = smov 0   ;;  %s1502_s17 = smov 0  }
   0x7   :  { %s1504_s18 = smov 0   ;;  %s1506_s19 = smov 0  }
   0x8 LB: > { %s1521_s0 = sadd.s32 4294967295, %s1466_s19   ;;  %s1308_s1 = sadd.s32 4294967294, %s1466_s19   ;;  %s1466_s19 = sphi %s1506_s19, %s2709_s19   ;;  %s1462_s18 = sphi %s1504_s18, %s2708_s18   ;;  %s1458_s17 = sphi %s1502_s17, %s2707_s17   ;;  %s1454_s16 = sphi %s1500_s16, %s2706_s16  }
   0x9   : > { %s1525_s20 = sadd.s32 1, %s1466_s19   ;;  %s70_s21 = sadd.s32 1, %s1462_s18 }
   0xa   : > { %s67_s22 = ssub.s32 %s1466_s19, %s1525_s20  ;;  %p77_p0 = scmp.ne.s32.totalorder %s1462_s18, %s1458_s17 }
   0xb   : > { %p68_p1 = scmp.eq.s32.totalorder %s67_s22, 0  ;;  %p78_p2 = scmp.eq.s32.totalorder %s1466_s19, 0 }
   0xc   : > { %p83_p3 = scmp.ne.s32.totalorder %s1458_s17, %s1454_s16  ;;  %p84_p4 = scmp.eq.s32.totalorder %s1521_s0, 0 }
   0xd   : > { %s1537_s23 = scalar_select %p68_p1, %s1462_s18, %s70_s21  }
   0xe   : > { %p1539_p5 = por %p78_p2, %p77_p0  ;;  %p1543_p6 = por %p84_p4, %p83_p3 }
   0xf   : > { %p107_p7 = scmp.eq.s32.totalorder %s1521_s0, 1  ;;  %p113_p8 = scmp.eq.s32.totalorder %s1308_s1, 1 }
  0x10   : > { %s2698_s25 = scalar_select %p1543_p6, 1, 0 }
  0x11   : > { %p1336_p10 = scmp.lt.s32.totalorder %s1466_s19, 2  ;;  %p1550_p11 = por %p107_p7, %p77_p0 }
  0x12   : > { %p1554_p12 = por %p113_p8, %p83_p3  ;;  %s139_s28 = sand.u32 1, %s1462_s18  }
  0x13   : > { %s2699_s26 = scalar_select %p1550_p11, 1, 0 }
  0x14   : > { %s2700_s27 = scalar_select %p1554_p12, 1, 0 }
  0x15   : > { %s1322_s29 = sshll.u32 %s1466_s19, 15  ;;  %s1311_s30 = sshll.u32 %s139_s28, 11 }
  0x16   : > { %s1563_s6 = scalar_lea.hbm %s2693_s2, %s1322_s29  ;;  %s143_s7 = scalar_lea.vmem [#allocation4], %s1311_s30 }
  0x17   : > { %s150_s8 = sshll.u32 %s143_s7, 4  ;;  %p1567_p13 = pnand %p1336_p10, %p1539_p5  ;;  %s1571_s8 = int_to_ptr.vmem [resolvable:$true] %s150_s8 }
  0x18   : > { %s1573_s10 = scalar_lea.sflag [#allocation5], %s139_s28  ;;  %s1374_s11 = scalar_lea.hbm %s1563_s6, 32768 }
  0x19   : > { %p1375_p0 = scmp.ne.s32.totalorder %s1563_s6, %s1374_s11  ;;  %p1376_p1 = pneg %p1567_p13 }
  0x1a   : > { %s1379_s14 = scalar_lea.hbm %s2693_s2, 65536  ;;  %p1380_p4 = scmp.lt.s32.totalorder %s1563_s6, %s2693_s2 }
  0x1b   : > { %p1377_p2 = pnand %p1376_p1, %p1375_p0  ;;  %p1381_p5 = scmp.lt.s32.totalorder %s1379_s14, %s1374_s11 }
  0x1d   : > { %p1378_p3 = pneg %p1377_p2  ;;  %p1382_p7 = por %p1381_p5, %p1380_p4 }
  0x1f   : > { %p1383_p8 = pnand %p1382_p7, %p1378_p3 }
  0x21   : > { %1386 = shalt.err (!%p1383_p8)
}
  0x22   : > { %s1387_s21 = scalar_lea.vmem %s1571_s8, 32768  ;;  %s1468_s22 = smov [#allocation4]  }
  0x23   : > { %p1388_p10 = scmp.ne.s32.totalorder %s1571_s8, %s1387_s21  ;;  %s1392_s24 = sshll.u32 %s1468_s22, 4  ;;  %s1393_s24 = int_to_ptr.vmem [resolvable:$false] %s1392_s24 }
  0x24   : > { %s1394_s28 = scalar_lea.vmem %s1393_s24, 65536  ;;  %p1395_p2 = scmp.lt.s32.totalorder %s1571_s8, %s1393_s24 }
  0x25   : > { %p1390_p9 = pnand %p1388_p10, %p1376_p1  ;;  %p1396_p12 = scmp.lt.s32.totalorder %s1394_s28, %s1387_s21 }
  0x27   : > { %p1391_p0 = pneg %p1390_p9  ;;  %p1397_p11 = por %p1396_p12, %p1395_p2 }
  0x29   : > { %p1398_p6 = pnand %p1397_p11, %p1391_p0 }
  0x2b   : > { %1401 = shalt.err (!%p1398_p6)
}
  0x2c   : > { %s1469_s29 = smov 128   ;;  %s1470_s30 = smov 8  }
  0x2d   : > { %1331 = dma.hbm_to_vmem [thread:$0]  (!%p1567_p13), %s1563_s6, 32768, %s1571_s8, %s1573_s10, %s1469_s29, %s1469_s29, %s1470_s30  }
  0x2e   : > { %p1314_p9 = scmp.ge.s32.totalorder %s1466_s19, 1  ;;  %p158_p1 = scmp.lt.s32.totalorder %s1466_s19, 3 }
  0x30   : > { %p159_p3 = pnand %p1314_p9, %p158_p1 }
  0x31   : > { %s1597_s4 = sand.u32 (!%p159_p3), 1, %s1458_s17   ;;  %p2702_p6 = scmp.ne.s32.totalorder (!%p159_p3), %s2698_s25, 0 }
  0x32   : > { %162 = sbr.rel (%p159_p3) target bundleno = 233 (0xe9), region = 32  ;;  %s1315_s5 = sshll.u32 (!%p159_p3), %s1597_s4, 11 }
  0x33   : > { %s165_s7 = scalar_lea.sflag (!%p159_p3), [#allocation5], %s1597_s4  ;;  %s1603_s11 = scalar_lea.vmem (!%p159_p3), [#allocation4], %s1315_s5 }
  0x37   : > { %1445 = dma.done.wait (%p2702_p6), %s165_s7, 32768  }
  0x38   : > { %1447 = vsyncadd (%p2702_p6), %s165_s7, 4294934528  ;;  %s449_s6 = sld [smem:[#allocation2]]  ;;  %v193_v0 = vld [vmem:[%s1603_s11] sm:$0xff]  ;;  %v194_v2 = vld [vmem:[%s1603_s11 + $0x8] sm:$0xff]  ;;  %s1644_s25 = scalar_lea.vmem [#allocation7], %s1315_s5 }
  0x39   : > { %s707_s8 = sld [smem:[#allocation3]]  ;;  %v195_v3 = vld [vmem:[%s1603_s11 + $0x10] sm:$0xff]  ;;  %v196_v8 = vld [vmem:[%s1603_s11 + $0x18] sm:$0xff]  ;;  %v197_v9 = vld [vmem:[%s1603_s11 + $0x20] sm:$0xff]  ;;  %s1323_s9 = sshll.u32 %s1521_s0, 15 }
  0x3a   : > { %v198_v10 = vld [vmem:[%s1603_s11 + $0x28] sm:$0xff]  ;;  %v199_v14 = vld [vmem:[%s1603_s11 + $0x30] sm:$0xff]  ;;  %v200_v15 = vld [vmem:[%s1603_s11 + $0x38] sm:$0xff]  ;;  %s1235_s10 = sshll.u32 %s1644_s25, 4  ;;  %s2640_s13 = scalar_lea.hbm %s2694_s3, %s1323_s9  ;;  %s2642_s10 = int_to_ptr.vmem [resolvable:$true] %s1235_s10 }
  0x3b   : > { %v201_v16 = vld [vmem:[%s1603_s11 + $0x40] sm:$0xff]  ;;  %v202_v21 = vld [vmem:[%s1603_s11 + $0x48] sm:$0xff]  ;;  %v203_v22 = vld [vmem:[%s1603_s11 + $0x50] sm:$0xff]  ;;  %s1222_s14 = scalar_lea.sflag [#allocation6], %s1597_s4  ;;  %s1402_s15 = scalar_lea.vmem %s2642_s10, 32768 }
  0x3c   : > { %v204_v23 = vld [vmem:[%s1603_s11 + $0x58] sm:$0xff]  ;;  %v205_v28 = vld [vmem:[%s1603_s11 + $0x60] sm:$0xff]  ;;  %v206_v29 = vld [vmem:[%s1603_s11 + $0x68] sm:$0xff]  ;;  %p1403_p11 = scmp.ne.s32.totalorder %s2642_s10, %s1402_s15  ;;  %p2703_p12 = scmp.ne.s32.totalorder %s2699_s26, 0 }
  0x3d   : > { %v207_v30 = vld [vmem:[%s1603_s11 + $0x70] sm:$0xff]  ;;  %v208_v35 = vld [vmem:[%s1603_s11 + $0x78] sm:$0xff]  ;;  %v209_v40 = vld [vmem:[%s1603_s11 + $0x80] sm:$0xff]  ;;  %s1471_s1 = smov [#allocation7]  }
  0x3e   : > { %v1610_v1 = vstv %s449_s6  ;;  %v210_v41 = vld [vmem:[%s1603_s11 + $0x88] sm:$0xff]  ;;  %v211_v42 = vld [vmem:[%s1603_s11 + $0x90] sm:$0xff]  ;;  %v212_v47 = vld [vmem:[%s1603_s11 + $0x98] sm:$0xff]  ;;  %p1404_p13 = pnand %p1403_p11, %p2703_p12  ;;  %s1406_s21 = sshll.u32 %s1471_s1, 4  ;;  %s1407_s21 = int_to_ptr.vmem [resolvable:$false] %s1406_s21 }
  0x3f   : > { %v451_v4 = vmul.f32 %v1610_v1, %v193_v0  ;;  %v1615_v5 = vstv %s707_s8  ;;  %v452_v6 = vmul.f32 %v1610_v1, %v194_v2  ;;  %v453_v7 = vmul.f32 %v1610_v1, %v195_v3  ;;  %v213_v48 = vld [vmem:[%s1603_s11 + $0xa0] sm:$0xff]  ;;  %v214_v49 = vld [vmem:[%s1603_s11 + $0xa8] sm:$0xff]  ;;  %v215_v54 = vld [vmem:[%s1603_s11 + $0xb0] sm:$0xff]  ;;  %s1408_s22 = scalar_lea.vmem %s1407_s21, 65536  ;;  %p1409_p5 = scmp.lt.s32.totalorder %s2642_s10, %s1407_s21 }
  0x40   : > { %v454_v11 = vmul.f32 %v1610_v1, %v196_v8  ;;  %v455_v12 = vmul.f32 %v1610_v1, %v197_v9  ;;  %v456_v13 = vmul.f32 %v1610_v1, %v198_v10  ;;  %v457_v20 = vmul.f32 %v1610_v1, %v199_v14  ;;  %v216_v59 = vld [vmem:[%s1603_s11 + $0xb8] sm:$0xff]  ;;  %v217_v0 = vld [vmem:[%s1603_s11 + $0xc0] sm:$0xff]  ;;  %v218_v2 = vld [vmem:[%s1603_s11 + $0xc8] sm:$0xff]  ;;  %p1405_p4 = pneg %p1404_p13  ;;  %p1410_p7 = scmp.lt.s32.totalorder %s1408_s22, %s1402_s15 }
  0x41   : > { %v709_v17 = vadd.f32 %v1615_v5, %v451_v4  ;;  %v710_v18 = vadd.f32 %v1615_v5, %v452_v6  ;;  %v711_v19 = vadd.f32 %v1615_v5, %v453_v7  ;;  %v458_v27 = vmul.f32 %v1610_v1, %v200_v15  ;;  %v219_v3 = vld [vmem:[%s1603_s11 + $0xd0] sm:$0xff]  ;;  %v220_v9 = vld [vmem:[%s1603_s11 + $0xd8] sm:$0xff]  ;;  %v221_v10 = vld [vmem:[%s1603_s11 + $0xe0] sm:$0xff] }
  0x42   : > { %v712_v24 = vadd.f32 %v1615_v5, %v454_v11  ;;  %v713_v25 = vadd.f32 %v1615_v5, %v455_v12  ;;  %v714_v26 = vadd.f32 %v1615_v5, %v456_v13  ;;  %v715_v31 = vadd.f32 %v1615_v5, %v457_v20  ;;  %v222_v11 = vld [vmem:[%s1603_s11 + $0xe8] sm:$0xff]  ;;  %p1411_p8 = por %p1410_p7, %p1409_p5 }
  0x43   : > { %965 = vst [vmem:[%s1644_s25] sm:$0xff] %v709_v17  ;;  %966 = vst [vmem:[%s1644_s25 + $0x8] sm:$0xff] %v710_v18  ;;  %v459_v32 = vmul.f32 %v1610_v1, %v201_v16  ;;  %v460_v33 = vmul.f32 %v1610_v1, %v202_v21  ;;  %v461_v34 = vmul.f32 %v1610_v1, %v203_v22  ;;  %v223_v16 = vld [vmem:[%s1603_s11 + $0xf0] sm:$0xff]  ;;  %v224_v21 = vld [vmem:[%s1603_s11 + $0xf8] sm:$0xff] }
  0x44   : > { %967 = vst [vmem:[%s1644_s25 + $0x10] sm:$0xff] %v711_v19  ;;  %968 = vst [vmem:[%s1644_s25 + $0x18] sm:$0xff] %v712_v24  ;;  %v716_v36 = vadd.f32 %v1615_v5, %v458_v27  ;;  %v462_v37 = vmul.f32 %v1610_v1, %v204_v23  ;;  %v463_v38 = vmul.f32 %v1610_v1, %v205_v28  ;;  %v226_v27 = vld [vmem:[%s1603_s11 + $0x108] sm:$0xff]  ;;  %v227_v28 = vld [vmem:[%s1603_s11 + $0x110] sm:$0xff]  ;;  %p1412_p10 = pnand %p1411_p8, %p1405_p4 }
  0x45   : > { %969 = vst [vmem:[%s1644_s25 + $0x20] sm:$0xff] %v713_v25  ;;  %970 = vst [vmem:[%s1644_s25 + $0x28] sm:$0xff] %v714_v26  ;;  %v464_v39 = vmul.f32 %v1610_v1, %v206_v29  ;;  %v717_v43 = vadd.f32 %v1615_v5, %v459_v32  ;;  %v718_v44 = vadd.f32 %v1615_v5, %v460_v33  ;;  %v225_v26 = vld [vmem:[%s1603_s11 + $0x100] sm:$0xff]  ;;  %v228_v33 = vld [vmem:[%s1603_s11 + $0x118] sm:$0xff] }
  0x46   : > { %971 = vst [vmem:[%s1644_s25 + $0x30] sm:$0xff] %v715_v31  ;;  %v719_v45 = vadd.f32 %v1615_v5, %v461_v34  ;;  %v465_v46 = vmul.f32 %v1610_v1, %v207_v30  ;;  %972 = vst [vmem:[%s1644_s25 + $0x38] sm:$0xff] %v716_v36  ;;  %v720_v50 = vadd.f32 %v1615_v5, %v462_v37  ;;  %v229_v34 = vld [vmem:[%s1603_s11 + $0x120] sm:$0xff] }
  0x47   : > { %v721_v51 = vadd.f32 %v1615_v5, %v463_v38  ;;  %v722_v52 = vadd.f32 %v1615_v5, %v464_v39  ;;  %v466_v53 = vmul.f32 %v1610_v1, %v208_v35  ;;  %973 = vst [vmem:[%s1644_s25 + $0x40] sm:$0xff] %v717_v43  ;;  %974 = vst [vmem:[%s1644_s25 + $0x48] sm:$0xff] %v718_v44  ;;  %v230_v35 = vld [vmem:[%s1603_s11 + $0x128] sm:$0xff] }
  0x48   : > { %975 = vst [vmem:[%s1644_s25 + $0x50] sm:$0xff] %v719_v45  ;;  %v723_v55 = vadd.f32 %v1615_v5, %v465_v46  ;;  %v467_v56 = vmul.f32 %v1610_v1, %v209_v40  ;;  %v468_v57 = vmul.f32 %v1610_v1, %v210_v41  ;;  %v469_v58 = vmul.f32 %v1610_v1, %v211_v42  ;;  %v231_v40 = vld [vmem:[%s1603_s11 + $0x130] sm:$0xff]  ;;  %v232_v45 = vld [vmem:[%s1603_s11 + $0x138] sm:$0xff] }
  0x49   : > { %976 = vst [vmem:[%s1644_s25 + $0x58] sm:$0xff] %v720_v50  ;;  %977 = vst [vmem:[%s1644_s25 + $0x60] sm:$0xff] %v721_v51  ;;  %v724_v60 = vadd.f32 %v1615_v5, %v466_v53  ;;  %v470_v61 = vmul.f32 %v1610_v1, %v212_v47  ;;  %v471_v62 = vmul.f32 %v1610_v1, %v213_v48  ;;  %v233_v50 = vld [vmem:[%s1603_s11 + $0x140] sm:$0xff]  ;;  %v234_v51 = vld [vmem:[%s1603_s11 + $0x148] sm:$0xff] }
  0x4a   : > { %978 = vst [vmem:[%s1644_s25 + $0x68] sm:$0xff] %v722_v52  ;;  %v472_v63 = vmul.f32 %v1610_v1, %v214_v49  ;;  %979 = vst [vmem:[%s1644_s25 + $0x70] sm:$0xff] %v723_v55  ;;  %v725_v4 = vadd.f32 %v1615_v5, %v467_v56  ;;  %v726_v6 = vadd.f32 %v1615_v5, %v468_v57  ;;  %v235_v52 = vld [vmem:[%s1603_s11 + $0x150] sm:$0xff]  ;;  %v236_v57 = vld [vmem:[%s1603_s11 + $0x158] sm:$0xff] }
  0x4b   : > { %v727_v7 = vadd.f32 %v1615_v5, %v469_v58  ;;  %v473_v8 = vmul.f32 %v1610_v1, %v215_v54  ;;  %980 = vst [vmem:[%s1644_s25 + $0x78] sm:$0xff] %v724_v60  ;;  %v728_v12 = vadd.f32 %v1615_v5, %v470_v61  ;;  %v729_v13 = vadd.f32 %v1615_v5, %v471_v62  ;;  %v237_v58 = vld [vmem:[%s1603_s11 + $0x160] sm:$0xff] }
  0x4c   : > { %v730_v14 = vadd.f32 %v1615_v5, %v472_v63  ;;  %v474_v15 = vmul.f32 %v1610_v1, %v216_v59  ;;  %981 = vst [vmem:[%s1644_s25 + $0x80] sm:$0xff] %v725_v4  ;;  %982 = vst [vmem:[%s1644_s25 + $0x88] sm:$0xff] %v726_v6  ;;  %v475_v18 = vmul.f32 %v1610_v1, %v217_v0  ;;  %v238_v59 = vld [vmem:[%s1603_s11 + $0x168] sm:$0xff]  ;;  %v239_v0 = vld [vmem:[%s1603_s11 + $0x170] sm:$0xff] }
  0x4d   : > { %983 = vst [vmem:[%s1644_s25 + $0x90] sm:$0xff] %v727_v7  ;;  %v731_v17 = vadd.f32 %v1615_v5, %v473_v8  ;;  %v476_v19 = vmul.f32 %v1610_v1, %v218_v2  ;;  %v477_v20 = vmul.f32 %v1610_v1, %v219_v3  ;;  %984 = vst [vmem:[%s1644_s25 + $0x98] sm:$0xff] %v728_v12  ;;  %v240_v7 = vld [vmem:[%s1603_s11 + $0x178] sm:$0xff]  ;;  %v241_v12 = vld [vmem:[%s1603_s11 + $0x180] sm:$0xff] }
  0x4e   : > { %985 = vst [vmem:[%s1644_s25 + $0xa0] sm:$0xff] %v729_v13  ;;  %986 = vst [vmem:[%s1644_s25 + $0xa8] sm:$0xff] %v730_v14  ;;  %v732_v22 = vadd.f32 %v1615_v5, %v474_v15  ;;  %v478_v23 = vmul.f32 %v1610_v1, %v220_v9  ;;  %v479_v24 = vmul.f32 %v1610_v1, %v221_v10  ;;  %v242_v13 = vld [vmem:[%s1603_s11 + $0x188] sm:$0xff]  ;;  %v243_v14 = vld [vmem:[%s1603_s11 + $0x190] sm:$0xff] }
  0x4f   : > { %v480_v25 = vmul.f32 %v1610_v1, %v222_v11  ;;  %987 = vst [vmem:[%s1644_s25 + $0xb0] sm:$0xff] %v731_v17  ;;  %v733_v29 = vadd.f32 %v1615_v5, %v475_v18  ;;  %v734_v30 = vadd.f32 %v1615_v5, %v476_v19  ;;  %v735_v31 = vadd.f32 %v1615_v5, %v477_v20  ;;  %v244_v19 = vld [vmem:[%s1603_s11 + $0x198] sm:$0xff]  ;;  %v245_v20 = vld [vmem:[%s1603_s11 + $0x1a0] sm:$0xff] }
  0x50   : > { %v481_v32 = vmul.f32 %v1610_v1, %v223_v16  ;;  %988 = vst [vmem:[%s1644_s25 + $0xb8] sm:$0xff] %v732_v22  ;;  %v736_v36 = vadd.f32 %v1615_v5, %v478_v23  ;;  %v737_v37 = vadd.f32 %v1615_v5, %v479_v24  ;;  %v482_v39 = vmul.f32 %v1610_v1, %v224_v21  ;;  %v246_v21 = vld [vmem:[%s1603_s11 + $0x1a8] sm:$0xff] }
  0x51   : > { %v738_v38 = vadd.f32 %v1615_v5, %v480_v25  ;;  %989 = vst [vmem:[%s1644_s25 + $0xc0] sm:$0xff] %v733_v29  ;;  %990 = vst [vmem:[%s1644_s25 + $0xc8] sm:$0xff] %v734_v30  ;;  %v483_v42 = vmul.f32 %v1610_v1, %v225_v26  ;;  %v484_v43 = vmul.f32 %v1610_v1, %v226_v27  ;;  %v247_v26 = vld [vmem:[%s1603_s11 + $0x1b0] sm:$0xff] }
  0x52   : > { %991 = vst [vmem:[%s1644_s25 + $0xd0] sm:$0xff] %v735_v31  ;;  %v739_v41 = vadd.f32 %v1615_v5, %v481_v32  ;;  %v485_v44 = vmul.f32 %v1610_v1, %v227_v28  ;;  %992 = vst [vmem:[%s1644_s25 + $0xd8] sm:$0xff] %v736_v36  ;;  %v740_v46 = vadd.f32 %v1615_v5, %v482_v39  ;;  %v248_v31 = vld [vmem:[%s1603_s11 + $0x1b8] sm:$0xff]  ;;  %v249_v36 = vld [vmem:[%s1603_s11 + $0x1c0] sm:$0xff] }
  0x53   : > { %993 = vst [vmem:[%s1644_s25 + $0xe0] sm:$0xff] %v737_v37  ;;  %994 = vst [vmem:[%s1644_s25 + $0xe8] sm:$0xff] %v738_v38  ;;  %v486_v47 = vmul.f32 %v1610_v1, %v228_v33  ;;  %v487_v48 = vmul.f32 %v1610_v1, %v229_v34  ;;  %v488_v49 = vmul.f32 %v1610_v1, %v230_v35  ;;  %v250_v37 = vld [vmem:[%s1603_s11 + $0x1c8] sm:$0xff]  ;;  %v251_v38 = vld [vmem:[%s1603_s11 + $0x1d0] sm:$0xff] }
  0x54   : > { %995 = vst [vmem:[%s1644_s25 + $0xf0] sm:$0xff] %v739_v41  ;;  %v741_v53 = vadd.f32 %v1615_v5, %v483_v42  ;;  %v742_v54 = vadd.f32 %v1615_v5, %v484_v43  ;;  %v743_v55 = vadd.f32 %v1615_v5, %v485_v44  ;;  %v489_v56 = vmul.f32 %v1610_v1, %v231_v40  ;;  %v252_v43 = vld [vmem:[%s1603_s11 + $0x1d8] sm:$0xff]  ;;  %v253_v44 = vld [vmem:[%s1603_s11 + $0x1e0] sm:$0xff] }
  0x55   : > { %996 = vst [vmem:[%s1644_s25 + $0xf8] sm:$0xff] %v740_v46  ;;  %v744_v60 = vadd.f32 %v1615_v5, %v486_v47  ;;  %v745_v61 = vadd.f32 %v1615_v5, %v487_v48  ;;  %v746_v62 = vadd.f32 %v1615_v5, %v488_v49  ;;  %v490_v63 = vmul.f32 %v1610_v1, %v232_v45  ;;  %v254_v45 = vld [vmem:[%s1603_s11 + $0x1e8] sm:$0xff] }
  0x56   : > { %997 = vst [vmem:[%s1644_s25 + $0x100] sm:$0xff] %v741_v53  ;;  %998 = vst [vmem:[%s1644_s25 + $0x108] sm:$0xff] %v742_v54  ;;  %v747_v2 = vadd.f32 %v1615_v5, %v489_v56  ;;  %v491_v3 = vmul.f32 %v1610_v1, %v233_v50  ;;  %v492_v4 = vmul.f32 %v1610_v1, %v234_v51  ;;  %v255_v50 = vld [vmem:[%s1603_s11 + $0x1f0] sm:$0xff] }
  0x57   : > { %999 = vst [vmem:[%s1644_s25 + $0x110] sm:$0xff] %v743_v55  ;;  %v493_v6 = vmul.f32 %v1610_v1, %v235_v52  ;;  %1000 = vst [vmem:[%s1644_s25 + $0x118] sm:$0xff] %v744_v60  ;;  %v748_v8 = vadd.f32 %v1615_v5, %v490_v63  ;;  %v494_v9 = vmul.f32 %v1610_v1, %v236_v57  ;;  %v256_v55 = vld [vmem:[%s1603_s11 + $0x1f8] sm:$0xff]  ;;  %v257_v60 = vld [vmem:[%s1603_s11 + $0x200] sm:$0xff] }
  0x58   : > { %1001 = vst [vmem:[%s1644_s25 + $0x120] sm:$0xff] %v745_v61  ;;  %1002 = vst [vmem:[%s1644_s25 + $0x128] sm:$0xff] %v746_v62  ;;  %v495_v10 = vmul.f32 %v1610_v1, %v237_v58  ;;  %v496_v11 = vmul.f32 %v1610_v1, %v238_v59  ;;  %v749_v15 = vadd.f32 %v1615_v5, %v491_v3  ;;  %v258_v61 = vld [vmem:[%s1603_s11 + $0x208] sm:$0xff]  ;;  %v259_v62 = vld [vmem:[%s1603_s11 + $0x210] sm:$0xff] }
  0x59   : > { %1003 = vst [vmem:[%s1644_s25 + $0x130] sm:$0xff] %v747_v2  ;;  %v750_v16 = vadd.f32 %v1615_v5, %v492_v4  ;;  %v751_v17 = vadd.f32 %v1615_v5, %v493_v6  ;;  %v497_v18 = vmul.f32 %v1610_v1, %v239_v0  ;;  %1004 = vst [vmem:[%s1644_s25 + $0x138] sm:$0xff] %v748_v8  ;;  %v260_v4 = vld [vmem:[%s1603_s11 + $0x218] sm:$0xff]  ;;  %v261_v6 = vld [vmem:[%s1603_s11 + $0x220] sm:$0xff] }
  0x5a   : > { %v752_v22 = vadd.f32 %v1615_v5, %v494_v9  ;;  %v753_v23 = vadd.f32 %v1615_v5, %v495_v10  ;;  %v754_v24 = vadd.f32 %v1615_v5, %v496_v11  ;;  %v498_v25 = vmul.f32 %v1610_v1, %v240_v7  ;;  %1005 = vst [vmem:[%s1644_s25 + $0x140] sm:$0xff] %v749_v15  ;;  %v262_v7 = vld [vmem:[%s1603_s11 + $0x228] sm:$0xff] }
  0x5b   : > { %1006 = vst [vmem:[%s1644_s25 + $0x148] sm:$0xff] %v750_v16  ;;  %1007 = vst [vmem:[%s1644_s25 + $0x150] sm:$0xff] %v751_v17  ;;  %v755_v27 = vadd.f32 %v1615_v5, %v497_v18  ;;  %v499_v28 = vmul.f32 %v1610_v1, %v241_v12  ;;  %v500_v29 = vmul.f32 %v1610_v1, %v242_v13  ;;  %v263_v12 = vld [vmem:[%s1603_s11 + $0x230] sm:$0xff]  ;;  %v264_v17 = vld [vmem:[%s1603_s11 + $0x238] sm:$0xff] }
  0x5c   : > { %v501_v30 = vmul.f32 %v1610_v1, %v243_v14  ;;  %1008 = vst [vmem:[%s1644_s25 + $0x158] sm:$0xff] %v752_v22  ;;  %1009 = vst [vmem:[%s1644_s25 + $0x160] sm:$0xff] %v753_v23  ;;  %v756_v32 = vadd.f32 %v1615_v5, %v498_v25  ;;  %v502_v33 = vmul.f32 %v1610_v1, %v244_v19  ;;  %v265_v22 = vld [vmem:[%s1603_s11 + $0x240] sm:$0xff]  ;;  %v266_v23 = vld [vmem:[%s1603_s11 + $0x248] sm:$0xff] }
  0x5d   : > { %1010 = vst [vmem:[%s1644_s25 + $0x168] sm:$0xff] %v754_v24  ;;  %v503_v34 = vmul.f32 %v1610_v1, %v245_v20  ;;  %v504_v35 = vmul.f32 %v1610_v1, %v246_v21  ;;  %1011 = vst [vmem:[%s1644_s25 + $0x170] sm:$0xff] %v755_v27  ;;  %v757_v39 = vadd.f32 %v1615_v5, %v499_v28  ;;  %v267_v24 = vld [vmem:[%s1603_s11 + $0x250] sm:$0xff] }
  0x5e   : > { %v758_v40 = vadd.f32 %v1615_v5, %v500_v29  ;;  %v759_v41 = vadd.f32 %v1615_v5, %v501_v30  ;;  %v505_v42 = vmul.f32 %v1610_v1, %v247_v26  ;;  %1012 = vst [vmem:[%s1644_s25 + $0x178] sm:$0xff] %v756_v32  ;;  %v760_v46 = vadd.f32 %v1615_v5, %v502_v33  ;;  %v268_v29 = vld [vmem:[%s1603_s11 + $0x258] sm:$0xff]  ;;  %v269_v30 = vld [vmem:[%s1603_s11 + $0x260] sm:$0xff] }
  0x5f   : > { %v761_v47 = vadd.f32 %v1615_v5, %v503_v34  ;;  %v762_v48 = vadd.f32 %v1615_v5, %v504_v35  ;;  %v506_v49 = vmul.f32 %v1610_v1, %v248_v31  ;;  %1013 = vst [vmem:[%s1644_s25 + $0x180] sm:$0xff] %v757_v39  ;;  %v507_v52 = vmul.f32 %v1610_v1, %v249_v36  ;;  %v270_v31 = vld [vmem:[%s1603_s11 + $0x268] sm:$0xff]  ;;  %v271_v36 = vld [vmem:[%s1603_s11 + $0x270] sm:$0xff] }
  0x60   : > { %1014 = vst [vmem:[%s1644_s25 + $0x188] sm:$0xff] %v758_v40  ;;  %1015 = vst [vmem:[%s1644_s25 + $0x190] sm:$0xff] %v759_v41  ;;  %v763_v51 = vadd.f32 %v1615_v5, %v505_v42  ;;  %v508_v53 = vmul.f32 %v1610_v1, %v250_v37  ;;  %v509_v54 = vmul.f32 %v1610_v1, %v251_v38  ;;  %v272_v41 = vld [vmem:[%s1603_s11 + $0x278] sm:$0xff] }
  0x61   : > { %1016 = vst [vmem:[%s1644_s25 + $0x198] sm:$0xff] %v760_v46  ;;  %1017 = vst [vmem:[%s1644_s25 + $0x1a0] sm:$0xff] %v761_v47  ;;  %v764_v56 = vadd.f32 %v1615_v5, %v506_v49  ;;  %v510_v57 = vmul.f32 %v1610_v1, %v252_v43  ;;  %v511_v58 = vmul.f32 %v1610_v1, %v253_v44  ;;  %v273_v46 = vld [vmem:[%s1603_s11 + $0x280] sm:$0xff]  ;;  %v274_v47 = vld [vmem:[%s1603_s11 + $0x288] sm:$0xff] }
  0x62   : > { %1018 = vst [vmem:[%s1644_s25 + $0x1a8] sm:$0xff] %v762_v48  ;;  %v512_v59 = vmul.f32 %v1610_v1, %v254_v45  ;;  %1019 = vst [vmem:[%s1644_s25 + $0x1b0] sm:$0xff] %v763_v51  ;;  %v765_v63 = vadd.f32 %v1615_v5, %v507_v52  ;;  %v766_v0 = vadd.f32 %v1615_v5, %v508_v53  ;;  %v275_v48 = vld [vmem:[%s1603_s11 + $0x290] sm:$0xff]  ;;  %v276_v53 = vld [vmem:[%s1603_s11 + $0x298] sm:$0xff] }
  0x63   : > { %v767_v2 = vadd.f32 %v1615_v5, %v509_v54  ;;  %v513_v3 = vmul.f32 %v1610_v1, %v255_v50  ;;  %1020 = vst [vmem:[%s1644_s25 + $0x1b8] sm:$0xff] %v764_v56  ;;  %v768_v8 = vadd.f32 %v1615_v5, %v510_v57  ;;  %v769_v9 = vadd.f32 %v1615_v5, %v511_v58  ;;  %v277_v54 = vld [vmem:[%s1603_s11 + $0x2a0] sm:$0xff] }
  0x64   : > { %v770_v10 = vadd.f32 %v1615_v5, %v512_v59  ;;  %v514_v11 = vmul.f32 %v1610_v1, %v256_v55  ;;  %1021 = vst [vmem:[%s1644_s25 + $0x1c0] sm:$0xff] %v765_v63  ;;  %1022 = vst [vmem:[%s1644_s25 + $0x1c8] sm:$0xff] %v766_v0  ;;  %v515_v14 = vmul.f32 %v1610_v1, %v257_v60  ;;  %v278_v55 = vld [vmem:[%s1603_s11 + $0x2a8] sm:$0xff]  ;;  %v279_v60 = vld [vmem:[%s1603_s11 + $0x2b0] sm:$0xff] }
  0x65   : > { %1023 = vst [vmem:[%s1644_s25 + $0x1d0] sm:$0xff] %v767_v2  ;;  %v771_v13 = vadd.f32 %v1615_v5, %v513_v3  ;;  %v516_v15 = vmul.f32 %v1610_v1, %v258_v61  ;;  %v517_v16 = vmul.f32 %v1610_v1, %v259_v62  ;;  %1024 = vst [vmem:[%s1644_s25 + $0x1d8] sm:$0xff] %v768_v8  ;;  %v280_v2 = vld [vmem:[%s1603_s11 + $0x2b8] sm:$0xff]  ;;  %v281_v8 = vld [vmem:[%s1603_s11 + $0x2c0] sm:$0xff] }
  0x66   : > { %1025 = vst [vmem:[%s1644_s25 + $0x1e0] sm:$0xff] %v769_v9  ;;  %1026 = vst [vmem:[%s1644_s25 + $0x1e8] sm:$0xff] %v770_v10  ;;  %v772_v18 = vadd.f32 %v1615_v5, %v514_v11  ;;  %v518_v19 = vmul.f32 %v1610_v1, %v260_v4  ;;  %v519_v20 = vmul.f32 %v1610_v1, %v261_v6  ;;  %v282_v9 = vld [vmem:[%s1603_s11 + $0x2c8] sm:$0xff]  ;;  %v283_v10 = vld [vmem:[%s1603_s11 + $0x2d0] sm:$0xff] }
  0x67   : > { %v520_v21 = vmul.f32 %v1610_v1, %v262_v7  ;;  %1027 = vst [vmem:[%s1644_s25 + $0x1f0] sm:$0xff] %v771_v13  ;;  %v773_v25 = vadd.f32 %v1615_v5, %v515_v14  ;;  %v774_v26 = vadd.f32 %v1615_v5, %v516_v15  ;;  %v775_v27 = vadd.f32 %v1615_v5, %v517_v16  ;;  %v284_v15 = vld [vmem:[%s1603_s11 + $0x2d8] sm:$0xff]  ;;  %v285_v16 = vld [vmem:[%s1603_s11 + $0x2e0] sm:$0xff] }
  0x68   : > { %v521_v28 = vmul.f32 %v1610_v1, %v263_v12  ;;  %1028 = vst [vmem:[%s1644_s25 + $0x1f8] sm:$0xff] %v772_v18  ;;  %v776_v32 = vadd.f32 %v1615_v5, %v518_v19  ;;  %v777_v33 = vadd.f32 %v1615_v5, %v519_v20  ;;  %v522_v35 = vmul.f32 %v1610_v1, %v264_v17  ;;  %v286_v17 = vld [vmem:[%s1603_s11 + $0x2e8] sm:$0xff] }
  0x69   : > { %v778_v34 = vadd.f32 %v1615_v5, %v520_v21  ;;  %1029 = vst [vmem:[%s1644_s25 + $0x200] sm:$0xff] %v773_v25  ;;  %1030 = vst [vmem:[%s1644_s25 + $0x208] sm:$0xff] %v774_v26  ;;  %v523_v38 = vmul.f32 %v1610_v1, %v265_v22  ;;  %v524_v39 = vmul.f32 %v1610_v1, %v266_v23  ;;  %v287_v22 = vld [vmem:[%s1603_s11 + $0x2f0] sm:$0xff] }
  0x6a   : > { %1031 = vst [vmem:[%s1644_s25 + $0x210] sm:$0xff] %v775_v27  ;;  %v779_v37 = vadd.f32 %v1615_v5, %v521_v28  ;;  %v525_v40 = vmul.f32 %v1610_v1, %v267_v24  ;;  %1032 = vst [vmem:[%s1644_s25 + $0x218] sm:$0xff] %v776_v32  ;;  %v780_v42 = vadd.f32 %v1615_v5, %v522_v35  ;;  %v288_v27 = vld [vmem:[%s1603_s11 + $0x2f8] sm:$0xff]  ;;  %v289_v32 = vld [vmem:[%s1603_s11 + $0x300] sm:$0xff] }
  0x6b   : > { %1033 = vst [vmem:[%s1644_s25 + $0x220] sm:$0xff] %v777_v33  ;;  %1034 = vst [vmem:[%s1644_s25 + $0x228] sm:$0xff] %v778_v34  ;;  %v526_v43 = vmul.f32 %v1610_v1, %v268_v29  ;;  %v527_v44 = vmul.f32 %v1610_v1, %v269_v30  ;;  %v528_v45 = vmul.f32 %v1610_v1, %v270_v31  ;;  %v290_v33 = vld [vmem:[%s1603_s11 + $0x308] sm:$0xff]  ;;  %v291_v34 = vld [vmem:[%s1603_s11 + $0x310] sm:$0xff] }
  0x6c   : > { %1035 = vst [vmem:[%s1644_s25 + $0x230] sm:$0xff] %v779_v37  ;;  %v781_v49 = vadd.f32 %v1615_v5, %v523_v38  ;;  %v782_v50 = vadd.f32 %v1615_v5, %v524_v39  ;;  %v783_v51 = vadd.f32 %v1615_v5, %v525_v40  ;;  %v529_v52 = vmul.f32 %v1610_v1, %v271_v36  ;;  %v292_v39 = vld [vmem:[%s1603_s11 + $0x318] sm:$0xff]  ;;  %v293_v40 = vld [vmem:[%s1603_s11 + $0x320] sm:$0xff] }
  0x6d   : > { %1036 = vst [vmem:[%s1644_s25 + $0x238] sm:$0xff] %v780_v42  ;;  %v784_v56 = vadd.f32 %v1615_v5, %v526_v43  ;;  %v785_v57 = vadd.f32 %v1615_v5, %v527_v44  ;;  %v786_v58 = vadd.f32 %v1615_v5, %v528_v45  ;;  %v530_v59 = vmul.f32 %v1610_v1, %v272_v41  ;;  %v294_v41 = vld [vmem:[%s1603_s11 + $0x328] sm:$0xff] }
  0x6e   : > { %1037 = vst [vmem:[%s1644_s25 + $0x240] sm:$0xff] %v781_v49  ;;  %1038 = vst [vmem:[%s1644_s25 + $0x248] sm:$0xff] %v782_v50  ;;  %v787_v61 = vadd.f32 %v1615_v5, %v529_v52  ;;  %v531_v62 = vmul.f32 %v1610_v1, %v273_v46  ;;  %v532_v63 = vmul.f32 %v1610_v1, %v274_v47  ;;  %v295_v46 = vld [vmem:[%s1603_s11 + $0x330] sm:$0xff] }
  0x6f   : > { %1039 = vst [vmem:[%s1644_s25 + $0x250] sm:$0xff] %v783_v51  ;;  %v533_v0 = vmul.f32 %v1610_v1, %v275_v48  ;;  %1040 = vst [vmem:[%s1644_s25 + $0x258] sm:$0xff] %v784_v56  ;;  %v788_v3 = vadd.f32 %v1615_v5, %v530_v59  ;;  %v534_v4 = vmul.f32 %v1610_v1, %v276_v53  ;;  %v296_v51 = vld [vmem:[%s1603_s11 + $0x338] sm:$0xff]  ;;  %v297_v56 = vld [vmem:[%s1603_s11 + $0x340] sm:$0xff] }
  0x70   : > { %1041 = vst [vmem:[%s1644_s25 + $0x260] sm:$0xff] %v785_v57  ;;  %1042 = vst [vmem:[%s1644_s25 + $0x268] sm:$0xff] %v786_v58  ;;  %v535_v6 = vmul.f32 %v1610_v1, %v277_v54  ;;  %v536_v7 = vmul.f32 %v1610_v1, %v278_v55  ;;  %v789_v11 = vadd.f32 %v1615_v5, %v531_v62  ;;  %v298_v57 = vld [vmem:[%s1603_s11 + $0x348] sm:$0xff]  ;;  %v299_v58 = vld [vmem:[%s1603_s11 + $0x350] sm:$0xff] }
  0x71   : > { %1043 = vst [vmem:[%s1644_s25 + $0x270] sm:$0xff] %v787_v61  ;;  %v790_v12 = vadd.f32 %v1615_v5, %v532_v63  ;;  %v791_v13 = vadd.f32 %v1615_v5, %v533_v0  ;;  %v537_v14 = vmul.f32 %v1610_v1, %v279_v60  ;;  %1044 = vst [vmem:[%s1644_s25 + $0x278] sm:$0xff] %v788_v3  ;;  %v300_v63 = vld [vmem:[%s1603_s11 + $0x358] sm:$0xff]  ;;  %v301_v0 = vld [vmem:[%s1603_s11 + $0x360] sm:$0xff] }
  0x72   : > { %v792_v18 = vadd.f32 %v1615_v5, %v534_v4  ;;  %v793_v19 = vadd.f32 %v1615_v5, %v535_v6  ;;  %v794_v20 = vadd.f32 %v1615_v5, %v536_v7  ;;  %v538_v21 = vmul.f32 %v1610_v1, %v280_v2  ;;  %1045 = vst [vmem:[%s1644_s25 + $0x280] sm:$0xff] %v789_v11  ;;  %v302_v2 = vld [vmem:[%s1603_s11 + $0x368] sm:$0xff] }
  0x73   : > { %1046 = vst [vmem:[%s1644_s25 + $0x288] sm:$0xff] %v790_v12  ;;  %1047 = vst [vmem:[%s1644_s25 + $0x290] sm:$0xff] %v791_v13  ;;  %v795_v23 = vadd.f32 %v1615_v5, %v537_v14  ;;  %v539_v24 = vmul.f32 %v1610_v1, %v281_v8  ;;  %v540_v25 = vmul.f32 %v1610_v1, %v282_v9  ;;  %v303_v8 = vld [vmem:[%s1603_s11 + $0x370] sm:$0xff]  ;;  %v304_v13 = vld [vmem:[%s1603_s11 + $0x378] sm:$0xff] }
  0x74   : > { %v541_v26 = vmul.f32 %v1610_v1, %v283_v10  ;;  %1048 = vst [vmem:[%s1644_s25 + $0x298] sm:$0xff] %v792_v18  ;;  %1049 = vst [vmem:[%s1644_s25 + $0x2a0] sm:$0xff] %v793_v19  ;;  %v796_v28 = vadd.f32 %v1615_v5, %v538_v21  ;;  %v542_v29 = vmul.f32 %v1610_v1, %v284_v15  ;;  %v305_v18 = vld [vmem:[%s1603_s11 + $0x380] sm:$0xff]  ;;  %v306_v19 = vld [vmem:[%s1603_s11 + $0x388] sm:$0xff] }
  0x75   : > { %1050 = vst [vmem:[%s1644_s25 + $0x2a8] sm:$0xff] %v794_v20  ;;  %v543_v30 = vmul.f32 %v1610_v1, %v285_v16  ;;  %v544_v31 = vmul.f32 %v1610_v1, %v286_v17  ;;  %1051 = vst [vmem:[%s1644_s25 + $0x2b0] sm:$0xff] %v795_v23  ;;  %v797_v35 = vadd.f32 %v1615_v5, %v539_v24  ;;  %v307_v20 = vld [vmem:[%s1603_s11 + $0x390] sm:$0xff] }
  0x76   : > { %v798_v36 = vadd.f32 %v1615_v5, %v540_v25  ;;  %v799_v37 = vadd.f32 %v1615_v5, %v541_v26  ;;  %v545_v38 = vmul.f32 %v1610_v1, %v287_v22  ;;  %1052 = vst [vmem:[%s1644_s25 + $0x2b8] sm:$0xff] %v796_v28  ;;  %v800_v42 = vadd.f32 %v1615_v5, %v542_v29  ;;  %v308_v25 = vld [vmem:[%s1603_s11 + $0x398] sm:$0xff]  ;;  %v309_v26 = vld [vmem:[%s1603_s11 + $0x3a0] sm:$0xff] }
  0x77   : > { %v801_v43 = vadd.f32 %v1615_v5, %v543_v30  ;;  %v802_v44 = vadd.f32 %v1615_v5, %v544_v31  ;;  %v546_v45 = vmul.f32 %v1610_v1, %v288_v27  ;;  %1053 = vst [vmem:[%s1644_s25 + $0x2c0] sm:$0xff] %v797_v35  ;;  %v547_v48 = vmul.f32 %v1610_v1, %v289_v32  ;;  %v310_v27 = vld [vmem:[%s1603_s11 + $0x3a8] sm:$0xff]  ;;  %v311_v32 = vld [vmem:[%s1603_s11 + $0x3b0] sm:$0xff] }
  0x78   : > { %1054 = vst [vmem:[%s1644_s25 + $0x2c8] sm:$0xff] %v798_v36  ;;  %1055 = vst [vmem:[%s1644_s25 + $0x2d0] sm:$0xff] %v799_v37  ;;  %v803_v47 = vadd.f32 %v1615_v5, %v545_v38  ;;  %v548_v49 = vmul.f32 %v1610_v1, %v290_v33  ;;  %v549_v50 = vmul.f32 %v1610_v1, %v291_v34  ;;  %v312_v37 = vld [vmem:[%s1603_s11 + $0x3b8] sm:$0xff] }
  0x79   : > { %1056 = vst [vmem:[%s1644_s25 + $0x2d8] sm:$0xff] %v800_v42  ;;  %1057 = vst [vmem:[%s1644_s25 + $0x2e0] sm:$0xff] %v801_v43  ;;  %v804_v52 = vadd.f32 %v1615_v5, %v546_v45  ;;  %v550_v53 = vmul.f32 %v1610_v1, %v292_v39  ;;  %v551_v54 = vmul.f32 %v1610_v1, %v293_v40  ;;  %v313_v42 = vld [vmem:[%s1603_s11 + $0x3c0] sm:$0xff]  ;;  %v314_v43 = vld [vmem:[%s1603_s11 + $0x3c8] sm:$0xff] }
  0x7a   : > { %1058 = vst [vmem:[%s1644_s25 + $0x2e8] sm:$0xff] %v802_v44  ;;  %v552_v55 = vmul.f32 %v1610_v1, %v294_v41  ;;  %1059 = vst [vmem:[%s1644_s25 + $0x2f0] sm:$0xff] %v803_v47  ;;  %v805_v59 = vadd.f32 %v1615_v5, %v547_v48  ;;  %v806_v60 = vadd.f32 %v1615_v5, %v548_v49  ;;  %v315_v44 = vld [vmem:[%s1603_s11 + $0x3d0] sm:$0xff]  ;;  %v316_v49 = vld [vmem:[%s1603_s11 + $0x3d8] sm:$0xff] }
  0x7b   : > { %v807_v61 = vadd.f32 %v1615_v5, %v549_v50  ;;  %v553_v62 = vmul.f32 %v1610_v1, %v295_v46  ;;  %1060 = vst [vmem:[%s1644_s25 + $0x2f8] sm:$0xff] %v804_v52  ;;  %v808_v3 = vadd.f32 %v1615_v5, %v550_v53  ;;  %v809_v4 = vadd.f32 %v1615_v5, %v551_v54  ;;  %v317_v50 = vld [vmem:[%s1603_s11 + $0x3e0] sm:$0xff] }
  0x7c   : > { %v810_v6 = vadd.f32 %v1615_v5, %v552_v55  ;;  %v554_v7 = vmul.f32 %v1610_v1, %v296_v51  ;;  %1061 = vst [vmem:[%s1644_s25 + $0x300] sm:$0xff] %v805_v59  ;;  %1062 = vst [vmem:[%s1644_s25 + $0x308] sm:$0xff] %v806_v60  ;;  %v555_v10 = vmul.f32 %v1610_v1, %v297_v56  ;;  %v318_v51 = vld [vmem:[%s1603_s11 + $0x3e8] sm:$0xff]  ;;  %v319_v56 = vld [vmem:[%s1603_s11 + $0x3f0] sm:$0xff] }
  0x7d   : > { %1063 = vst [vmem:[%s1644_s25 + $0x310] sm:$0xff] %v807_v61  ;;  %v811_v9 = vadd.f32 %v1615_v5, %v553_v62  ;;  %v556_v11 = vmul.f32 %v1610_v1, %v298_v57  ;;  %v557_v12 = vmul.f32 %v1610_v1, %v299_v58  ;;  %1064 = vst [vmem:[%s1644_s25 + $0x318] sm:$0xff] %v808_v3  ;;  %v320_v61 = vld [vmem:[%s1603_s11 + $0x3f8] sm:$0xff]  ;;  %v321_v3 = vld [vmem:[%s1603_s11 + $0x400] sm:$0xff] }
  0x7e   : > { %1065 = vst [vmem:[%s1644_s25 + $0x320] sm:$0xff] %v809_v4  ;;  %1066 = vst [vmem:[%s1644_s25 + $0x328] sm:$0xff] %v810_v6  ;;  %v812_v14 = vadd.f32 %v1615_v5, %v554_v7  ;;  %v558_v15 = vmul.f32 %v1610_v1, %v300_v63  ;;  %v559_v16 = vmul.f32 %v1610_v1, %v301_v0  ;;  %v322_v4 = vld [vmem:[%s1603_s11 + $0x408] sm:$0xff]  ;;  %v323_v6 = vld [vmem:[%s1603_s11 + $0x410] sm:$0xff] }
  0x7f   : > { %v560_v17 = vmul.f32 %v1610_v1, %v302_v2  ;;  %1067 = vst [vmem:[%s1644_s25 + $0x330] sm:$0xff] %v811_v9  ;;  %v813_v21 = vadd.f32 %v1615_v5, %v555_v10  ;;  %v814_v22 = vadd.f32 %v1615_v5, %v556_v11  ;;  %v815_v23 = vadd.f32 %v1615_v5, %v557_v12  ;;  %v324_v11 = vld [vmem:[%s1603_s11 + $0x418] sm:$0xff]  ;;  %v325_v12 = vld [vmem:[%s1603_s11 + $0x420] sm:$0xff] }
  0x80   : > { %v561_v24 = vmul.f32 %v1610_v1, %v303_v8  ;;  %1068 = vst [vmem:[%s1644_s25 + $0x338] sm:$0xff] %v812_v14  ;;  %v816_v28 = vadd.f32 %v1615_v5, %v558_v15  ;;  %v817_v29 = vadd.f32 %v1615_v5, %v559_v16  ;;  %v562_v31 = vmul.f32 %v1610_v1, %v304_v13  ;;  %v326_v13 = vld [vmem:[%s1603_s11 + $0x428] sm:$0xff] }
  0x81   : > { %v818_v30 = vadd.f32 %v1615_v5, %v560_v17  ;;  %1069 = vst [vmem:[%s1644_s25 + $0x340] sm:$0xff] %v813_v21  ;;  %1070 = vst [vmem:[%s1644_s25 + $0x348] sm:$0xff] %v814_v22  ;;  %v563_v34 = vmul.f32 %v1610_v1, %v305_v18  ;;  %v564_v35 = vmul.f32 %v1610_v1, %v306_v19  ;;  %v327_v18 = vld [vmem:[%s1603_s11 + $0x430] sm:$0xff] }
  0x82   : > { %1071 = vst [vmem:[%s1644_s25 + $0x350] sm:$0xff] %v815_v23  ;;  %v819_v33 = vadd.f32 %v1615_v5, %v561_v24  ;;  %v565_v36 = vmul.f32 %v1610_v1, %v307_v20  ;;  %1072 = vst [vmem:[%s1644_s25 + $0x358] sm:$0xff] %v816_v28  ;;  %v820_v38 = vadd.f32 %v1615_v5, %v562_v31  ;;  %v328_v23 = vld [vmem:[%s1603_s11 + $0x438] sm:$0xff]  ;;  %v329_v28 = vld [vmem:[%s1603_s11 + $0x440] sm:$0xff] }
  0x83   : > { %1073 = vst [vmem:[%s1644_s25 + $0x360] sm:$0xff] %v817_v29  ;;  %1074 = vst [vmem:[%s1644_s25 + $0x368] sm:$0xff] %v818_v30  ;;  %v566_v39 = vmul.f32 %v1610_v1, %v308_v25  ;;  %v567_v40 = vmul.f32 %v1610_v1, %v309_v26  ;;  %v568_v41 = vmul.f32 %v1610_v1, %v310_v27  ;;  %v330_v29 = vld [vmem:[%s1603_s11 + $0x448] sm:$0xff]  ;;  %v331_v30 = vld [vmem:[%s1603_s11 + $0x450] sm:$0xff] }
  0x84   : > { %1075 = vst [vmem:[%s1644_s25 + $0x370] sm:$0xff] %v819_v33  ;;  %v821_v45 = vadd.f32 %v1615_v5, %v563_v34  ;;  %v822_v46 = vadd.f32 %v1615_v5, %v564_v35  ;;  %v823_v47 = vadd.f32 %v1615_v5, %v565_v36  ;;  %v569_v48 = vmul.f32 %v1610_v1, %v311_v32  ;;  %v332_v35 = vld [vmem:[%s1603_s11 + $0x458] sm:$0xff]  ;;  %v333_v36 = vld [vmem:[%s1603_s11 + $0x460] sm:$0xff] }
  0x85   : > { %1076 = vst [vmem:[%s1644_s25 + $0x378] sm:$0xff] %v820_v38  ;;  %v824_v52 = vadd.f32 %v1615_v5, %v566_v39  ;;  %v825_v53 = vadd.f32 %v1615_v5, %v567_v40  ;;  %v826_v54 = vadd.f32 %v1615_v5, %v568_v41  ;;  %v570_v55 = vmul.f32 %v1610_v1, %v312_v37  ;;  %v334_v37 = vld [vmem:[%s1603_s11 + $0x468] sm:$0xff] }
  0x86   : > { %1077 = vst [vmem:[%s1644_s25 + $0x380] sm:$0xff] %v821_v45  ;;  %1078 = vst [vmem:[%s1644_s25 + $0x388] sm:$0xff] %v822_v46  ;;  %v827_v57 = vadd.f32 %v1615_v5, %v569_v48  ;;  %v571_v58 = vmul.f32 %v1610_v1, %v313_v42  ;;  %v572_v59 = vmul.f32 %v1610_v1, %v314_v43  ;;  %v335_v42 = vld [vmem:[%s1603_s11 + $0x470] sm:$0xff] }
  0x87   : > { %1079 = vst [vmem:[%s1644_s25 + $0x390] sm:$0xff] %v823_v47  ;;  %v573_v60 = vmul.f32 %v1610_v1, %v315_v44  ;;  %1080 = vst [vmem:[%s1644_s25 + $0x398] sm:$0xff] %v824_v52  ;;  %v828_v62 = vadd.f32 %v1615_v5, %v570_v55  ;;  %v574_v63 = vmul.f32 %v1610_v1, %v316_v49  ;;  %v336_v47 = vld [vmem:[%s1603_s11 + $0x478] sm:$0xff]  ;;  %v337_v52 = vld [vmem:[%s1603_s11 + $0x480] sm:$0xff] }
  0x88   : > { %1081 = vst [vmem:[%s1644_s25 + $0x3a0] sm:$0xff] %v825_v53  ;;  %1082 = vst [vmem:[%s1644_s25 + $0x3a8] sm:$0xff] %v826_v54  ;;  %v575_v0 = vmul.f32 %v1610_v1, %v317_v50  ;;  %v576_v2 = vmul.f32 %v1610_v1, %v318_v51  ;;  %v829_v7 = vadd.f32 %v1615_v5, %v571_v58  ;;  %v338_v53 = vld [vmem:[%s1603_s11 + $0x488] sm:$0xff]  ;;  %v339_v54 = vld [vmem:[%s1603_s11 + $0x490] sm:$0xff] }
  0x89   : > { %1083 = vst [vmem:[%s1644_s25 + $0x3b0] sm:$0xff] %v827_v57  ;;  %v830_v8 = vadd.f32 %v1615_v5, %v572_v59  ;;  %v831_v9 = vadd.f32 %v1615_v5, %v573_v60  ;;  %v577_v10 = vmul.f32 %v1610_v1, %v319_v56  ;;  %1084 = vst [vmem:[%s1644_s25 + $0x3b8] sm:$0xff] %v828_v62  ;;  %v340_v59 = vld [vmem:[%s1603_s11 + $0x498] sm:$0xff]  ;;  %v341_v60 = vld [vmem:[%s1603_s11 + $0x4a0] sm:$0xff] }
  0x8a   : > { %v832_v14 = vadd.f32 %v1615_v5, %v574_v63  ;;  %v833_v15 = vadd.f32 %v1615_v5, %v575_v0  ;;  %v834_v16 = vadd.f32 %v1615_v5, %v576_v2  ;;  %v578_v17 = vmul.f32 %v1610_v1, %v320_v61  ;;  %1085 = vst [vmem:[%s1644_s25 + $0x3c0] sm:$0xff] %v829_v7  ;;  %v342_v61 = vld [vmem:[%s1603_s11 + $0x4a8] sm:$0xff] }
  0x8b   : > { %1086 = vst [vmem:[%s1644_s25 + $0x3c8] sm:$0xff] %v830_v8  ;;  %1087 = vst [vmem:[%s1644_s25 + $0x3d0] sm:$0xff] %v831_v9  ;;  %v835_v19 = vadd.f32 %v1615_v5, %v577_v10  ;;  %v579_v20 = vmul.f32 %v1610_v1, %v321_v3  ;;  %v580_v21 = vmul.f32 %v1610_v1, %v322_v4  ;;  %v343_v3 = vld [vmem:[%s1603_s11 + $0x4b0] sm:$0xff]  ;;  %v344_v9 = vld [vmem:[%s1603_s11 + $0x4b8] sm:$0xff] }
  0x8c   : > { %v581_v22 = vmul.f32 %v1610_v1, %v323_v6  ;;  %1088 = vst [vmem:[%s1644_s25 + $0x3d8] sm:$0xff] %v832_v14  ;;  %1089 = vst [vmem:[%s1644_s25 + $0x3e0] sm:$0xff] %v833_v15  ;;  %v836_v24 = vadd.f32 %v1615_v5, %v578_v17  ;;  %v582_v25 = vmul.f32 %v1610_v1, %v324_v11  ;;  %v345_v14 = vld [vmem:[%s1603_s11 + $0x4c0] sm:$0xff]  ;;  %v346_v15 = vld [vmem:[%s1603_s11 + $0x4c8] sm:$0xff] }
  0x8d   : > { %1090 = vst [vmem:[%s1644_s25 + $0x3e8] sm:$0xff] %v834_v16  ;;  %v583_v26 = vmul.f32 %v1610_v1, %v325_v12  ;;  %v584_v27 = vmul.f32 %v1610_v1, %v326_v13  ;;  %1091 = vst [vmem:[%s1644_s25 + $0x3f0] sm:$0xff] %v835_v19  ;;  %v837_v31 = vadd.f32 %v1615_v5, %v579_v20  ;;  %v347_v16 = vld [vmem:[%s1603_s11 + $0x4d0] sm:$0xff] }
  0x8e   : > { %v838_v32 = vadd.f32 %v1615_v5, %v580_v21  ;;  %v839_v33 = vadd.f32 %v1615_v5, %v581_v22  ;;  %v585_v34 = vmul.f32 %v1610_v1, %v327_v18  ;;  %1092 = vst [vmem:[%s1644_s25 + $0x3f8] sm:$0xff] %v836_v24  ;;  %v840_v38 = vadd.f32 %v1615_v5, %v582_v25  ;;  %v348_v21 = vld [vmem:[%s1603_s11 + $0x4d8] sm:$0xff]  ;;  %v349_v22 = vld [vmem:[%s1603_s11 + $0x4e0] sm:$0xff] }
  0x8f   : > { %v841_v39 = vadd.f32 %v1615_v5, %v583_v26  ;;  %v842_v40 = vadd.f32 %v1615_v5, %v584_v27  ;;  %v586_v41 = vmul.f32 %v1610_v1, %v328_v23  ;;  %1093 = vst [vmem:[%s1644_s25 + $0x400] sm:$0xff] %v837_v31  ;;  %v587_v44 = vmul.f32 %v1610_v1, %v329_v28  ;;  %v350_v23 = vld [vmem:[%s1603_s11 + $0x4e8] sm:$0xff]  ;;  %v351_v28 = vld [vmem:[%s1603_s11 + $0x4f0] sm:$0xff] }
  0x90   : > { %1094 = vst [vmem:[%s1644_s25 + $0x408] sm:$0xff] %v838_v32  ;;  %1095 = vst [vmem:[%s1644_s25 + $0x410] sm:$0xff] %v839_v33  ;;  %v843_v43 = vadd.f32 %v1615_v5, %v585_v34  ;;  %v588_v45 = vmul.f32 %v1610_v1, %v330_v29  ;;  %v589_v46 = vmul.f32 %v1610_v1, %v331_v30  ;;  %v352_v33 = vld [vmem:[%s1603_s11 + $0x4f8] sm:$0xff] }
  0x91   : > { %1096 = vst [vmem:[%s1644_s25 + $0x418] sm:$0xff] %v840_v38  ;;  %1097 = vst [vmem:[%s1644_s25 + $0x420] sm:$0xff] %v841_v39  ;;  %v844_v48 = vadd.f32 %v1615_v5, %v586_v41  ;;  %v590_v49 = vmul.f32 %v1610_v1, %v332_v35  ;;  %v591_v50 = vmul.f32 %v1610_v1, %v333_v36  ;;  %v353_v38 = vld [vmem:[%s1603_s11 + $0x500] sm:$0xff]  ;;  %v354_v39 = vld [vmem:[%s1603_s11 + $0x508] sm:$0xff] }
  0x92   : > { %1098 = vst [vmem:[%s1644_s25 + $0x428] sm:$0xff] %v842_v40  ;;  %v592_v51 = vmul.f32 %v1610_v1, %v334_v37  ;;  %1099 = vst [vmem:[%s1644_s25 + $0x430] sm:$0xff] %v843_v43  ;;  %v845_v55 = vadd.f32 %v1615_v5, %v587_v44  ;;  %v846_v56 = vadd.f32 %v1615_v5, %v588_v45  ;;  %v355_v40 = vld [vmem:[%s1603_s11 + $0x510] sm:$0xff]  ;;  %v356_v45 = vld [vmem:[%s1603_s11 + $0x518] sm:$0xff] }
  0x93   : > { %v847_v57 = vadd.f32 %v1615_v5, %v589_v46  ;;  %v593_v58 = vmul.f32 %v1610_v1, %v335_v42  ;;  %1100 = vst [vmem:[%s1644_s25 + $0x438] sm:$0xff] %v844_v48  ;;  %v848_v62 = vadd.f32 %v1615_v5, %v590_v49  ;;  %v849_v63 = vadd.f32 %v1615_v5, %v591_v50  ;;  %v357_v46 = vld [vmem:[%s1603_s11 + $0x520] sm:$0xff] }
  0x94   : > { %v850_v0 = vadd.f32 %v1615_v5, %v592_v51  ;;  %v594_v2 = vmul.f32 %v1610_v1, %v336_v47  ;;  %1101 = vst [vmem:[%s1644_s25 + $0x440] sm:$0xff] %v845_v55  ;;  %1102 = vst [vmem:[%s1644_s25 + $0x448] sm:$0xff] %v846_v56  ;;  %v595_v6 = vmul.f32 %v1610_v1, %v337_v52  ;;  %v358_v47 = vld [vmem:[%s1603_s11 + $0x528] sm:$0xff]  ;;  %v359_v52 = vld [vmem:[%s1603_s11 + $0x530] sm:$0xff] }
  0x95   : > { %1103 = vst [vmem:[%s1644_s25 + $0x450] sm:$0xff] %v847_v57  ;;  %v851_v4 = vadd.f32 %v1615_v5, %v593_v58  ;;  %v596_v7 = vmul.f32 %v1610_v1, %v338_v53  ;;  %v597_v8 = vmul.f32 %v1610_v1, %v339_v54  ;;  %1104 = vst [vmem:[%s1644_s25 + $0x458] sm:$0xff] %v848_v62  ;;  %v360_v57 = vld [vmem:[%s1603_s11 + $0x538] sm:$0xff]  ;;  %v361_v62 = vld [vmem:[%s1603_s11 + $0x540] sm:$0xff] }
  0x96   : > { %1105 = vst [vmem:[%s1644_s25 + $0x460] sm:$0xff] %v849_v63  ;;  %1106 = vst [vmem:[%s1644_s25 + $0x468] sm:$0xff] %v850_v0  ;;  %v852_v10 = vadd.f32 %v1615_v5, %v594_v2  ;;  %v598_v11 = vmul.f32 %v1610_v1, %v340_v59  ;;  %v599_v12 = vmul.f32 %v1610_v1, %v341_v60  ;;  %v362_v63 = vld [vmem:[%s1603_s11 + $0x548] sm:$0xff]  ;;  %v363_v0 = vld [vmem:[%s1603_s11 + $0x550] sm:$0xff] }
  0x97   : > { %v600_v13 = vmul.f32 %v1610_v1, %v342_v61  ;;  %1107 = vst [vmem:[%s1644_s25 + $0x470] sm:$0xff] %v851_v4  ;;  %v853_v17 = vadd.f32 %v1615_v5, %v595_v6  ;;  %v854_v18 = vadd.f32 %v1615_v5, %v596_v7  ;;  %v855_v19 = vadd.f32 %v1615_v5, %v597_v8  ;;  %v364_v7 = vld [vmem:[%s1603_s11 + $0x558] sm:$0xff]  ;;  %v365_v8 = vld [vmem:[%s1603_s11 + $0x560] sm:$0xff] }
  0x98   : > { %v601_v20 = vmul.f32 %v1610_v1, %v343_v3  ;;  %1108 = vst [vmem:[%s1644_s25 + $0x478] sm:$0xff] %v852_v10  ;;  %v856_v24 = vadd.f32 %v1615_v5, %v598_v11  ;;  %v857_v25 = vadd.f32 %v1615_v5, %v599_v12  ;;  %v602_v27 = vmul.f32 %v1610_v1, %v344_v9  ;;  %v366_v9 = vld [vmem:[%s1603_s11 + $0x568] sm:$0xff] }
  0x99   : > { %v858_v26 = vadd.f32 %v1615_v5, %v600_v13  ;;  %1109 = vst [vmem:[%s1644_s25 + $0x480] sm:$0xff] %v853_v17  ;;  %1110 = vst [vmem:[%s1644_s25 + $0x488] sm:$0xff] %v854_v18  ;;  %v603_v30 = vmul.f32 %v1610_v1, %v345_v14  ;;  %v604_v31 = vmul.f32 %v1610_v1, %v346_v15  ;;  %v367_v14 = vld [vmem:[%s1603_s11 + $0x570] sm:$0xff] }
  0x9a   : > { %1111 = vst [vmem:[%s1644_s25 + $0x490] sm:$0xff] %v855_v19  ;;  %v859_v29 = vadd.f32 %v1615_v5, %v601_v20  ;;  %v605_v32 = vmul.f32 %v1610_v1, %v347_v16  ;;  %1112 = vst [vmem:[%s1644_s25 + $0x498] sm:$0xff] %v856_v24  ;;  %v860_v34 = vadd.f32 %v1615_v5, %v602_v27  ;;  %v368_v19 = vld [vmem:[%s1603_s11 + $0x578] sm:$0xff]  ;;  %v369_v24 = vld [vmem:[%s1603_s11 + $0x580] sm:$0xff] }
  0x9b   : > { %1113 = vst [vmem:[%s1644_s25 + $0x4a0] sm:$0xff] %v857_v25  ;;  %1114 = vst [vmem:[%s1644_s25 + $0x4a8] sm:$0xff] %v858_v26  ;;  %v606_v35 = vmul.f32 %v1610_v1, %v348_v21  ;;  %v607_v36 = vmul.f32 %v1610_v1, %v349_v22  ;;  %v608_v37 = vmul.f32 %v1610_v1, %v350_v23  ;;  %v370_v25 = vld [vmem:[%s1603_s11 + $0x588] sm:$0xff]  ;;  %v371_v26 = vld [vmem:[%s1603_s11 + $0x590] sm:$0xff] }
  0x9c   : > { %1115 = vst [vmem:[%s1644_s25 + $0x4b0] sm:$0xff] %v859_v29  ;;  %v861_v41 = vadd.f32 %v1615_v5, %v603_v30  ;;  %v862_v42 = vadd.f32 %v1615_v5, %v604_v31  ;;  %v863_v43 = vadd.f32 %v1615_v5, %v605_v32  ;;  %v609_v44 = vmul.f32 %v1610_v1, %v351_v28  ;;  %v372_v31 = vld [vmem:[%s1603_s11 + $0x598] sm:$0xff]  ;;  %v373_v32 = vld [vmem:[%s1603_s11 + $0x5a0] sm:$0xff] }
  0x9d   : > { %1116 = vst [vmem:[%s1644_s25 + $0x4b8] sm:$0xff] %v860_v34  ;;  %v864_v48 = vadd.f32 %v1615_v5, %v606_v35  ;;  %v865_v49 = vadd.f32 %v1615_v5, %v607_v36  ;;  %v866_v50 = vadd.f32 %v1615_v5, %v608_v37  ;;  %v610_v51 = vmul.f32 %v1610_v1, %v352_v33  ;;  %v374_v33 = vld [vmem:[%s1603_s11 + $0x5a8] sm:$0xff] }
  0x9e   : > { %1117 = vst [vmem:[%s1644_s25 + $0x4c0] sm:$0xff] %v861_v41  ;;  %1118 = vst [vmem:[%s1644_s25 + $0x4c8] sm:$0xff] %v862_v42  ;;  %v867_v53 = vadd.f32 %v1615_v5, %v609_v44  ;;  %v611_v54 = vmul.f32 %v1610_v1, %v353_v38  ;;  %v612_v55 = vmul.f32 %v1610_v1, %v354_v39  ;;  %v375_v38 = vld [vmem:[%s1603_s11 + $0x5b0] sm:$0xff] }
  0x9f   : > { %1119 = vst [vmem:[%s1644_s25 + $0x4d0] sm:$0xff] %v863_v43  ;;  %v613_v56 = vmul.f32 %v1610_v1, %v355_v40  ;;  %1120 = vst [vmem:[%s1644_s25 + $0x4d8] sm:$0xff] %v864_v48  ;;  %v868_v58 = vadd.f32 %v1615_v5, %v610_v51  ;;  %v614_v59 = vmul.f32 %v1610_v1, %v356_v45  ;;  %v376_v43 = vld [vmem:[%s1603_s11 + $0x5b8] sm:$0xff]  ;;  %v377_v48 = vld [vmem:[%s1603_s11 + $0x5c0] sm:$0xff] }
  0xa0   : > { %1121 = vst [vmem:[%s1644_s25 + $0x4e0] sm:$0xff] %v865_v49  ;;  %1122 = vst [vmem:[%s1644_s25 + $0x4e8] sm:$0xff] %v866_v50  ;;  %v615_v60 = vmul.f32 %v1610_v1, %v357_v46  ;;  %v616_v61 = vmul.f32 %v1610_v1, %v358_v47  ;;  %v869_v2 = vadd.f32 %v1615_v5, %v611_v54  ;;  %v378_v49 = vld [vmem:[%s1603_s11 + $0x5c8] sm:$0xff]  ;;  %v379_v50 = vld [vmem:[%s1603_s11 + $0x5d0] sm:$0xff] }
  0xa1   : > { %1123 = vst [vmem:[%s1644_s25 + $0x4f0] sm:$0xff] %v867_v53  ;;  %v870_v3 = vadd.f32 %v1615_v5, %v612_v55  ;;  %v871_v4 = vadd.f32 %v1615_v5, %v613_v56  ;;  %v617_v6 = vmul.f32 %v1610_v1, %v359_v52  ;;  %1124 = vst [vmem:[%s1644_s25 + $0x4f8] sm:$0xff] %v868_v58  ;;  %v380_v55 = vld [vmem:[%s1603_s11 + $0x5d8] sm:$0xff]  ;;  %v381_v56 = vld [vmem:[%s1603_s11 + $0x5e0] sm:$0xff] }
  0xa2   : > { %v872_v10 = vadd.f32 %v1615_v5, %v614_v59  ;;  %v873_v11 = vadd.f32 %v1615_v5, %v615_v60  ;;  %v874_v12 = vadd.f32 %v1615_v5, %v616_v61  ;;  %v618_v13 = vmul.f32 %v1610_v1, %v360_v57  ;;  %1125 = vst [vmem:[%s1644_s25 + $0x500] sm:$0xff] %v869_v2  ;;  %v382_v57 = vld [vmem:[%s1603_s11 + $0x5e8] sm:$0xff] }
  0xa3   : > { %1126 = vst [vmem:[%s1644_s25 + $0x508] sm:$0xff] %v870_v3  ;;  %1127 = vst [vmem:[%s1644_s25 + $0x510] sm:$0xff] %v871_v4  ;;  %v875_v15 = vadd.f32 %v1615_v5, %v617_v6  ;;  %v619_v16 = vmul.f32 %v1610_v1, %v361_v62  ;;  %v620_v17 = vmul.f32 %v1610_v1, %v362_v63  ;;  %v383_v62 = vld [vmem:[%s1603_s11 + $0x5f0] sm:$0xff]  ;;  %v384_v4 = vld [vmem:[%s1603_s11 + $0x5f8] sm:$0xff] }
  0xa4   : > { %v621_v18 = vmul.f32 %v1610_v1, %v363_v0  ;;  %1128 = vst [vmem:[%s1644_s25 + $0x518] sm:$0xff] %v872_v10  ;;  %1129 = vst [vmem:[%s1644_s25 + $0x520] sm:$0xff] %v873_v11  ;;  %v876_v20 = vadd.f32 %v1615_v5, %v618_v13  ;;  %v622_v21 = vmul.f32 %v1610_v1, %v364_v7  ;;  %v385_v10 = vld [vmem:[%s1603_s11 + $0x600] sm:$0xff]  ;;  %v386_v11 = vld [vmem:[%s1603_s11 + $0x608] sm:$0xff] }
  0xa5   : > { %1130 = vst [vmem:[%s1644_s25 + $0x528] sm:$0xff] %v874_v12  ;;  %v623_v22 = vmul.f32 %v1610_v1, %v365_v8  ;;  %v624_v23 = vmul.f32 %v1610_v1, %v366_v9  ;;  %1131 = vst [vmem:[%s1644_s25 + $0x530] sm:$0xff] %v875_v15  ;;  %v877_v27 = vadd.f32 %v1615_v5, %v619_v16  ;;  %v387_v12 = vld [vmem:[%s1603_s11 + $0x610] sm:$0xff] }
  0xa6   : > { %v878_v28 = vadd.f32 %v1615_v5, %v620_v17  ;;  %v879_v29 = vadd.f32 %v1615_v5, %v621_v18  ;;  %v625_v30 = vmul.f32 %v1610_v1, %v367_v14  ;;  %1132 = vst [vmem:[%s1644_s25 + $0x538] sm:$0xff] %v876_v20  ;;  %v880_v34 = vadd.f32 %v1615_v5, %v622_v21  ;;  %v388_v17 = vld [vmem:[%s1603_s11 + $0x618] sm:$0xff]  ;;  %v389_v18 = vld [vmem:[%s1603_s11 + $0x620] sm:$0xff] }
  0xa7   : > { %v881_v35 = vadd.f32 %v1615_v5, %v623_v22  ;;  %v882_v36 = vadd.f32 %v1615_v5, %v624_v23  ;;  %v626_v37 = vmul.f32 %v1610_v1, %v368_v19  ;;  %1133 = vst [vmem:[%s1644_s25 + $0x540] sm:$0xff] %v877_v27  ;;  %v627_v40 = vmul.f32 %v1610_v1, %v369_v24  ;;  %v390_v19 = vld [vmem:[%s1603_s11 + $0x628] sm:$0xff]  ;;  %v391_v24 = vld [vmem:[%s1603_s11 + $0x630] sm:$0xff] }
  0xa8   : > { %1134 = vst [vmem:[%s1644_s25 + $0x548] sm:$0xff] %v878_v28  ;;  %1135 = vst [vmem:[%s1644_s25 + $0x550] sm:$0xff] %v879_v29  ;;  %v883_v39 = vadd.f32 %v1615_v5, %v625_v30  ;;  %v628_v41 = vmul.f32 %v1610_v1, %v370_v25  ;;  %v629_v42 = vmul.f32 %v1610_v1, %v371_v26  ;;  %v392_v29 = vld [vmem:[%s1603_s11 + $0x638] sm:$0xff] }
  0xa9   : > { %1136 = vst [vmem:[%s1644_s25 + $0x558] sm:$0xff] %v880_v34  ;;  %1137 = vst [vmem:[%s1644_s25 + $0x560] sm:$0xff] %v881_v35  ;;  %v884_v44 = vadd.f32 %v1615_v5, %v626_v37  ;;  %v630_v45 = vmul.f32 %v1610_v1, %v372_v31  ;;  %v631_v46 = vmul.f32 %v1610_v1, %v373_v32  ;;  %v393_v34 = vld [vmem:[%s1603_s11 + $0x640] sm:$0xff]  ;;  %v394_v35 = vld [vmem:[%s1603_s11 + $0x648] sm:$0xff] }
  0xaa   : > { %1138 = vst [vmem:[%s1644_s25 + $0x568] sm:$0xff] %v882_v36  ;;  %v632_v47 = vmul.f32 %v1610_v1, %v374_v33  ;;  %1139 = vst [vmem:[%s1644_s25 + $0x570] sm:$0xff] %v883_v39  ;;  %v885_v51 = vadd.f32 %v1615_v5, %v627_v40  ;;  %v886_v52 = vadd.f32 %v1615_v5, %v628_v41  ;;  %v395_v36 = vld [vmem:[%s1603_s11 + $0x650] sm:$0xff]  ;;  %v396_v41 = vld [vmem:[%s1603_s11 + $0x658] sm:$0xff] }
  0xab   : > { %v887_v53 = vadd.f32 %v1615_v5, %v629_v42  ;;  %v633_v54 = vmul.f32 %v1610_v1, %v375_v38  ;;  %1140 = vst [vmem:[%s1644_s25 + $0x578] sm:$0xff] %v884_v44  ;;  %v888_v58 = vadd.f32 %v1615_v5, %v630_v45  ;;  %v889_v59 = vadd.f32 %v1615_v5, %v631_v46  ;;  %v397_v42 = vld [vmem:[%s1603_s11 + $0x660] sm:$0xff] }
  0xac   : > { %v890_v60 = vadd.f32 %v1615_v5, %v632_v47  ;;  %v634_v61 = vmul.f32 %v1610_v1, %v376_v43  ;;  %1141 = vst [vmem:[%s1644_s25 + $0x580] sm:$0xff] %v885_v51  ;;  %1142 = vst [vmem:[%s1644_s25 + $0x588] sm:$0xff] %v886_v52  ;;  %v635_v0 = vmul.f32 %v1610_v1, %v377_v48  ;;  %v398_v43 = vld [vmem:[%s1603_s11 + $0x668] sm:$0xff]  ;;  %v399_v48 = vld [vmem:[%s1603_s11 + $0x670] sm:$0xff] }
  0xad   : > { %1143 = vst [vmem:[%s1644_s25 + $0x590] sm:$0xff] %v887_v53  ;;  %v891_v63 = vadd.f32 %v1615_v5, %v633_v54  ;;  %v636_v2 = vmul.f32 %v1610_v1, %v378_v49  ;;  %v637_v3 = vmul.f32 %v1610_v1, %v379_v50  ;;  %1144 = vst [vmem:[%s1644_s25 + $0x598] sm:$0xff] %v888_v58  ;;  %v400_v53 = vld [vmem:[%s1603_s11 + $0x678] sm:$0xff]  ;;  %v401_v58 = vld [vmem:[%s1603_s11 + $0x680] sm:$0xff] }
  0xae   : > { %1145 = vst [vmem:[%s1644_s25 + $0x5a0] sm:$0xff] %v889_v59  ;;  %1146 = vst [vmem:[%s1644_s25 + $0x5a8] sm:$0xff] %v890_v60  ;;  %v892_v6 = vadd.f32 %v1615_v5, %v634_v61  ;;  %v638_v7 = vmul.f32 %v1610_v1, %v380_v55  ;;  %v639_v8 = vmul.f32 %v1610_v1, %v381_v56  ;;  %v402_v59 = vld [vmem:[%s1603_s11 + $0x688] sm:$0xff]  ;;  %v403_v60 = vld [vmem:[%s1603_s11 + $0x690] sm:$0xff] }
  0xaf   : > { %v640_v9 = vmul.f32 %v1610_v1, %v382_v57  ;;  %1147 = vst [vmem:[%s1644_s25 + $0x5b0] sm:$0xff] %v891_v63  ;;  %v893_v13 = vadd.f32 %v1615_v5, %v635_v0  ;;  %v894_v14 = vadd.f32 %v1615_v5, %v636_v2  ;;  %v895_v15 = vadd.f32 %v1615_v5, %v637_v3  ;;  %v404_v2 = vld [vmem:[%s1603_s11 + $0x698] sm:$0xff]  ;;  %v405_v3 = vld [vmem:[%s1603_s11 + $0x6a0] sm:$0xff] }
  0xb0   : > { %v641_v16 = vmul.f32 %v1610_v1, %v383_v62  ;;  %1148 = vst [vmem:[%s1644_s25 + $0x5b8] sm:$0xff] %v892_v6  ;;  %v896_v20 = vadd.f32 %v1615_v5, %v638_v7  ;;  %v897_v21 = vadd.f32 %v1615_v5, %v639_v8  ;;  %v642_v23 = vmul.f32 %v1610_v1, %v384_v4  ;;  %v406_v4 = vld [vmem:[%s1603_s11 + $0x6a8] sm:$0xff] }
  0xb1   : > { %v898_v22 = vadd.f32 %v1615_v5, %v640_v9  ;;  %1149 = vst [vmem:[%s1644_s25 + $0x5c0] sm:$0xff] %v893_v13  ;;  %1150 = vst [vmem:[%s1644_s25 + $0x5c8] sm:$0xff] %v894_v14  ;;  %v643_v26 = vmul.f32 %v1610_v1, %v385_v10  ;;  %v644_v27 = vmul.f32 %v1610_v1, %v386_v11  ;;  %v407_v10 = vld [vmem:[%s1603_s11 + $0x6b0] sm:$0xff] }
  0xb2   : > { %1151 = vst [vmem:[%s1644_s25 + $0x5d0] sm:$0xff] %v895_v15  ;;  %v899_v25 = vadd.f32 %v1615_v5, %v641_v16  ;;  %v645_v28 = vmul.f32 %v1610_v1, %v387_v12  ;;  %1152 = vst [vmem:[%s1644_s25 + $0x5d8] sm:$0xff] %v896_v20  ;;  %v900_v30 = vadd.f32 %v1615_v5, %v642_v23  ;;  %v408_v15 = vld [vmem:[%s1603_s11 + $0x6b8] sm:$0xff]  ;;  %v409_v20 = vld [vmem:[%s1603_s11 + $0x6c0] sm:$0xff] }
  0xb3   : > { %1153 = vst [vmem:[%s1644_s25 + $0x5e0] sm:$0xff] %v897_v21  ;;  %1154 = vst [vmem:[%s1644_s25 + $0x5e8] sm:$0xff] %v898_v22  ;;  %v646_v31 = vmul.f32 %v1610_v1, %v388_v17  ;;  %v647_v32 = vmul.f32 %v1610_v1, %v389_v18  ;;  %v648_v33 = vmul.f32 %v1610_v1, %v390_v19  ;;  %v410_v21 = vld [vmem:[%s1603_s11 + $0x6c8] sm:$0xff]  ;;  %v411_v22 = vld [vmem:[%s1603_s11 + $0x6d0] sm:$0xff] }
  0xb4   : > { %1155 = vst [vmem:[%s1644_s25 + $0x5f0] sm:$0xff] %v899_v25  ;;  %v901_v37 = vadd.f32 %v1615_v5, %v643_v26  ;;  %v902_v38 = vadd.f32 %v1615_v5, %v644_v27  ;;  %v903_v39 = vadd.f32 %v1615_v5, %v645_v28  ;;  %v649_v40 = vmul.f32 %v1610_v1, %v391_v24  ;;  %v412_v27 = vld [vmem:[%s1603_s11 + $0x6d8] sm:$0xff]  ;;  %v413_v28 = vld [vmem:[%s1603_s11 + $0x6e0] sm:$0xff] }
  0xb5   : > { %1156 = vst [vmem:[%s1644_s25 + $0x5f8] sm:$0xff] %v900_v30  ;;  %v904_v44 = vadd.f32 %v1615_v5, %v646_v31  ;;  %v905_v45 = vadd.f32 %v1615_v5, %v647_v32  ;;  %v906_v46 = vadd.f32 %v1615_v5, %v648_v33  ;;  %v650_v47 = vmul.f32 %v1610_v1, %v392_v29  ;;  %v414_v29 = vld [vmem:[%s1603_s11 + $0x6e8] sm:$0xff] }
  0xb6   : > { %1157 = vst [vmem:[%s1644_s25 + $0x600] sm:$0xff] %v901_v37  ;;  %1158 = vst [vmem:[%s1644_s25 + $0x608] sm:$0xff] %v902_v38  ;;  %v907_v49 = vadd.f32 %v1615_v5, %v649_v40  ;;  %v651_v50 = vmul.f32 %v1610_v1, %v393_v34  ;;  %v652_v51 = vmul.f32 %v1610_v1, %v394_v35  ;;  %v415_v34 = vld [vmem:[%s1603_s11 + $0x6f0] sm:$0xff] }
  0xb7   : > { %1159 = vst [vmem:[%s1644_s25 + $0x610] sm:$0xff] %v903_v39  ;;  %v653_v52 = vmul.f32 %v1610_v1, %v395_v36  ;;  %1160 = vst [vmem:[%s1644_s25 + $0x618] sm:$0xff] %v904_v44  ;;  %v908_v54 = vadd.f32 %v1615_v5, %v650_v47  ;;  %v654_v55 = vmul.f32 %v1610_v1, %v396_v41  ;;  %v416_v39 = vld [vmem:[%s1603_s11 + $0x6f8] sm:$0xff]  ;;  %v417_v44 = vld [vmem:[%s1603_s11 + $0x700] sm:$0xff] }
  0xb8   : > { %1161 = vst [vmem:[%s1644_s25 + $0x620] sm:$0xff] %v905_v45  ;;  %1162 = vst [vmem:[%s1644_s25 + $0x628] sm:$0xff] %v906_v46  ;;  %v655_v56 = vmul.f32 %v1610_v1, %v397_v42  ;;  %v656_v57 = vmul.f32 %v1610_v1, %v398_v43  ;;  %v909_v61 = vadd.f32 %v1615_v5, %v651_v50  ;;  %v418_v45 = vld [vmem:[%s1603_s11 + $0x708] sm:$0xff]  ;;  %v419_v46 = vld [vmem:[%s1603_s11 + $0x710] sm:$0xff] }
  0xb9   : > { %1163 = vst [vmem:[%s1644_s25 + $0x630] sm:$0xff] %v907_v49  ;;  %v910_v62 = vadd.f32 %v1615_v5, %v652_v51  ;;  %v911_v63 = vadd.f32 %v1615_v5, %v653_v52  ;;  %v657_v0 = vmul.f32 %v1610_v1, %v399_v48  ;;  %1164 = vst [vmem:[%s1644_s25 + $0x638] sm:$0xff] %v908_v54  ;;  %v420_v51 = vld [vmem:[%s1603_s11 + $0x718] sm:$0xff]  ;;  %v421_v52 = vld [vmem:[%s1603_s11 + $0x720] sm:$0xff] }
  0xba   : > { %v912_v6 = vadd.f32 %v1615_v5, %v654_v55  ;;  %v913_v7 = vadd.f32 %v1615_v5, %v655_v56  ;;  %v914_v8 = vadd.f32 %v1615_v5, %v656_v57  ;;  %v658_v9 = vmul.f32 %v1610_v1, %v400_v53  ;;  %1165 = vst [vmem:[%s1644_s25 + $0x640] sm:$0xff] %v909_v61  ;;  %v422_v53 = vld [vmem:[%s1603_s11 + $0x728] sm:$0xff] }
  0xbb   : > { %1166 = vst [vmem:[%s1644_s25 + $0x648] sm:$0xff] %v910_v62  ;;  %1167 = vst [vmem:[%s1644_s25 + $0x650] sm:$0xff] %v911_v63  ;;  %v915_v11 = vadd.f32 %v1615_v5, %v657_v0  ;;  %v659_v12 = vmul.f32 %v1610_v1, %v401_v58  ;;  %v660_v13 = vmul.f32 %v1610_v1, %v402_v59  ;;  %v423_v58 = vld [vmem:[%s1603_s11 + $0x730] sm:$0xff]  ;;  %v424_v63 = vld [vmem:[%s1603_s11 + $0x738] sm:$0xff] }
  0xbc   : > { %v661_v14 = vmul.f32 %v1610_v1, %v403_v60  ;;  %1168 = vst [vmem:[%s1644_s25 + $0x658] sm:$0xff] %v912_v6  ;;  %1169 = vst [vmem:[%s1644_s25 + $0x660] sm:$0xff] %v913_v7  ;;  %v916_v16 = vadd.f32 %v1615_v5, %v658_v9  ;;  %v662_v17 = vmul.f32 %v1610_v1, %v404_v2  ;;  %v425_v6 = vld [vmem:[%s1603_s11 + $0x740] sm:$0xff]  ;;  %v426_v7 = vld [vmem:[%s1603_s11 + $0x748] sm:$0xff] }
  0xbd   : > { %1170 = vst [vmem:[%s1644_s25 + $0x668] sm:$0xff] %v914_v8  ;;  %v663_v18 = vmul.f32 %v1610_v1, %v405_v3  ;;  %v664_v19 = vmul.f32 %v1610_v1, %v406_v4  ;;  %1171 = vst [vmem:[%s1644_s25 + $0x670] sm:$0xff] %v915_v11  ;;  %v917_v23 = vadd.f32 %v1615_v5, %v659_v12  ;;  %v427_v8 = vld [vmem:[%s1603_s11 + $0x750] sm:$0xff] }
  0xbe   : > { %v918_v24 = vadd.f32 %v1615_v5, %v660_v13  ;;  %v919_v25 = vadd.f32 %v1615_v5, %v661_v14  ;;  %v665_v26 = vmul.f32 %v1610_v1, %v407_v10  ;;  %1172 = vst [vmem:[%s1644_s25 + $0x678] sm:$0xff] %v916_v16  ;;  %v920_v30 = vadd.f32 %v1615_v5, %v662_v17  ;;  %v428_v13 = vld [vmem:[%s1603_s11 + $0x758] sm:$0xff]  ;;  %v429_v14 = vld [vmem:[%s1603_s11 + $0x760] sm:$0xff] }
  0xbf   : > { %v921_v31 = vadd.f32 %v1615_v5, %v663_v18  ;;  %v922_v32 = vadd.f32 %v1615_v5, %v664_v19  ;;  %v666_v33 = vmul.f32 %v1610_v1, %v408_v15  ;;  %1173 = vst [vmem:[%s1644_s25 + $0x680] sm:$0xff] %v917_v23  ;;  %v667_v36 = vmul.f32 %v1610_v1, %v409_v20  ;;  %v430_v15 = vld [vmem:[%s1603_s11 + $0x768] sm:$0xff]  ;;  %v431_v20 = vld [vmem:[%s1603_s11 + $0x770] sm:$0xff] }
  0xc0   : > { %1174 = vst [vmem:[%s1644_s25 + $0x688] sm:$0xff] %v918_v24  ;;  %1175 = vst [vmem:[%s1644_s25 + $0x690] sm:$0xff] %v919_v25  ;;  %v923_v35 = vadd.f32 %v1615_v5, %v665_v26  ;;  %v668_v37 = vmul.f32 %v1610_v1, %v410_v21  ;;  %v669_v38 = vmul.f32 %v1610_v1, %v411_v22  ;;  %v432_v25 = vld [vmem:[%s1603_s11 + $0x778] sm:$0xff] }
  0xc1   : > { %1176 = vst [vmem:[%s1644_s25 + $0x698] sm:$0xff] %v920_v30  ;;  %1177 = vst [vmem:[%s1644_s25 + $0x6a0] sm:$0xff] %v921_v31  ;;  %v924_v40 = vadd.f32 %v1615_v5, %v666_v33  ;;  %v670_v41 = vmul.f32 %v1610_v1, %v412_v27  ;;  %v671_v42 = vmul.f32 %v1610_v1, %v413_v28  ;;  %v433_v30 = vld [vmem:[%s1603_s11 + $0x780] sm:$0xff]  ;;  %v434_v31 = vld [vmem:[%s1603_s11 + $0x788] sm:$0xff] }
  0xc2   : > { %1178 = vst [vmem:[%s1644_s25 + $0x6a8] sm:$0xff] %v922_v32  ;;  %v672_v43 = vmul.f32 %v1610_v1, %v414_v29  ;;  %1179 = vst [vmem:[%s1644_s25 + $0x6b0] sm:$0xff] %v923_v35  ;;  %v925_v47 = vadd.f32 %v1615_v5, %v667_v36  ;;  %v926_v48 = vadd.f32 %v1615_v5, %v668_v37  ;;  %v435_v32 = vld [vmem:[%s1603_s11 + $0x790] sm:$0xff]  ;;  %v436_v37 = vld [vmem:[%s1603_s11 + $0x798] sm:$0xff] }
  0xc3   : > { %v927_v49 = vadd.f32 %v1615_v5, %v669_v38  ;;  %v673_v50 = vmul.f32 %v1610_v1, %v415_v34  ;;  %1180 = vst [vmem:[%s1644_s25 + $0x6b8] sm:$0xff] %v924_v40  ;;  %v928_v54 = vadd.f32 %v1615_v5, %v670_v41  ;;  %v929_v55 = vadd.f32 %v1615_v5, %v671_v42  ;;  %v437_v38 = vld [vmem:[%s1603_s11 + $0x7a0] sm:$0xff] }
  0xc4   : > { %v930_v56 = vadd.f32 %v1615_v5, %v672_v43  ;;  %v674_v57 = vmul.f32 %v1610_v1, %v416_v39  ;;  %1181 = vst [vmem:[%s1644_s25 + $0x6c0] sm:$0xff] %v925_v47  ;;  %1182 = vst [vmem:[%s1644_s25 + $0x6c8] sm:$0xff] %v926_v48  ;;  %v675_v60 = vmul.f32 %v1610_v1, %v417_v44  ;;  %v438_v39 = vld [vmem:[%s1603_s11 + $0x7a8] sm:$0xff]  ;;  %v439_v44 = vld [vmem:[%s1603_s11 + $0x7b0] sm:$0xff] }
  0xc5   : > { %1183 = vst [vmem:[%s1644_s25 + $0x6d0] sm:$0xff] %v927_v49  ;;  %v931_v59 = vadd.f32 %v1615_v5, %v673_v50  ;;  %v676_v61 = vmul.f32 %v1610_v1, %v418_v45  ;;  %v677_v62 = vmul.f32 %v1610_v1, %v419_v46  ;;  %1184 = vst [vmem:[%s1644_s25 + $0x6d8] sm:$0xff] %v928_v54  ;;  %v440_v49 = vld [vmem:[%s1603_s11 + $0x7b8] sm:$0xff]  ;;  %v441_v54 = vld [vmem:[%s1603_s11 + $0x7c0] sm:$0xff] }
  0xc6   : > { %1185 = vst [vmem:[%s1644_s25 + $0x6e0] sm:$0xff] %v929_v55  ;;  %1186 = vst [vmem:[%s1644_s25 + $0x6e8] sm:$0xff] %v930_v56  ;;  %v932_v0 = vadd.f32 %v1615_v5, %v674_v57  ;;  %v678_v2 = vmul.f32 %v1610_v1, %v420_v51  ;;  %v679_v3 = vmul.f32 %v1610_v1, %v421_v52  ;;  %v442_v55 = vld [vmem:[%s1603_s11 + $0x7c8] sm:$0xff]  ;;  %v443_v56 = vld [vmem:[%s1603_s11 + $0x7d0] sm:$0xff] }
  0xc7   : > { %v680_v4 = vmul.f32 %v1610_v1, %v422_v53  ;;  %1187 = vst [vmem:[%s1644_s25 + $0x6f0] sm:$0xff] %v931_v59  ;;  %v933_v9 = vadd.f32 %v1615_v5, %v675_v60  ;;  %v934_v10 = vadd.f32 %v1615_v5, %v676_v61  ;;  %v935_v11 = vadd.f32 %v1615_v5, %v677_v62  ;;  %v444_v61 = vld [vmem:[%s1603_s11 + $0x7d8] sm:$0xff]  ;;  %v445_v62 = vld [vmem:[%s1603_s11 + $0x7e0] sm:$0xff] }
  0xc8   : > { %v681_v12 = vmul.f32 %v1610_v1, %v423_v58  ;;  %1188 = vst [vmem:[%s1644_s25 + $0x6f8] sm:$0xff] %v932_v0  ;;  %v936_v16 = vadd.f32 %v1615_v5, %v678_v2  ;;  %v937_v17 = vadd.f32 %v1615_v5, %v679_v3  ;;  %v682_v19 = vmul.f32 %v1610_v1, %v424_v63  ;;  %v446_v63 = vld [vmem:[%s1603_s11 + $0x7e8] sm:$0xff] }
  0xc9   : > { %v938_v18 = vadd.f32 %v1615_v5, %v680_v4  ;;  %1189 = vst [vmem:[%s1644_s25 + $0x700] sm:$0xff] %v933_v9  ;;  %1190 = vst [vmem:[%s1644_s25 + $0x708] sm:$0xff] %v934_v10  ;;  %v683_v22 = vmul.f32 %v1610_v1, %v425_v6  ;;  %v684_v23 = vmul.f32 %v1610_v1, %v426_v7  ;;  %v447_v6 = vld [vmem:[%s1603_s11 + $0x7f0] sm:$0xff] }
  0xca   : > { %1191 = vst [vmem:[%s1644_s25 + $0x710] sm:$0xff] %v935_v11  ;;  %v939_v21 = vadd.f32 %v1615_v5, %v681_v12  ;;  %v685_v24 = vmul.f32 %v1610_v1, %v427_v8  ;;  %1192 = vst [vmem:[%s1644_s25 + $0x718] sm:$0xff] %v936_v16  ;;  %v940_v26 = vadd.f32 %v1615_v5, %v682_v19  ;;  %v448_v11 = vld [vmem:[%s1603_s11 + $0x7f8] sm:$0xff] }
  0xcb   : > { %1193 = vst [vmem:[%s1644_s25 + $0x720] sm:$0xff] %v937_v17  ;;  %1194 = vst [vmem:[%s1644_s25 + $0x728] sm:$0xff] %v938_v18  ;;  %v686_v27 = vmul.f32 %v1610_v1, %v428_v13  ;;  %v687_v28 = vmul.f32 %v1610_v1, %v429_v14  ;;  %v688_v29 = vmul.f32 %v1610_v1, %v430_v15 }
  0xcc   : > { %1195 = vst [vmem:[%s1644_s25 + $0x730] sm:$0xff] %v939_v21  ;;  %v941_v33 = vadd.f32 %v1615_v5, %v683_v22  ;;  %v942_v34 = vadd.f32 %v1615_v5, %v684_v23  ;;  %v943_v35 = vadd.f32 %v1615_v5, %v685_v24  ;;  %v689_v36 = vmul.f32 %v1610_v1, %v431_v20 }
  0xcd   : > { %1196 = vst [vmem:[%s1644_s25 + $0x738] sm:$0xff] %v940_v26  ;;  %v944_v40 = vadd.f32 %v1615_v5, %v686_v27  ;;  %v945_v41 = vadd.f32 %v1615_v5, %v687_v28  ;;  %v946_v42 = vadd.f32 %v1615_v5, %v688_v29  ;;  %v690_v43 = vmul.f32 %v1610_v1, %v432_v25 }
  0xce   : > { %1197 = vst [vmem:[%s1644_s25 + $0x740] sm:$0xff] %v941_v33  ;;  %1198 = vst [vmem:[%s1644_s25 + $0x748] sm:$0xff] %v942_v34  ;;  %v947_v45 = vadd.f32 %v1615_v5, %v689_v36  ;;  %v691_v46 = vmul.f32 %v1610_v1, %v433_v30  ;;  %v692_v47 = vmul.f32 %v1610_v1, %v434_v31 }
  0xcf   : > { %1199 = vst [vmem:[%s1644_s25 + $0x750] sm:$0xff] %v943_v35  ;;  %v693_v48 = vmul.f32 %v1610_v1, %v435_v32  ;;  %1200 = vst [vmem:[%s1644_s25 + $0x758] sm:$0xff] %v944_v40  ;;  %v948_v50 = vadd.f32 %v1615_v5, %v690_v43  ;;  %v694_v51 = vmul.f32 %v1610_v1, %v436_v37 }
  0xd0   : > { %1201 = vst [vmem:[%s1644_s25 + $0x760] sm:$0xff] %v945_v41  ;;  %1202 = vst [vmem:[%s1644_s25 + $0x768] sm:$0xff] %v946_v42  ;;  %v695_v52 = vmul.f32 %v1610_v1, %v437_v38  ;;  %v696_v53 = vmul.f32 %v1610_v1, %v438_v39  ;;  %v949_v57 = vadd.f32 %v1615_v5, %v691_v46 }
  0xd1   : > { %1203 = vst [vmem:[%s1644_s25 + $0x770] sm:$0xff] %v947_v45  ;;  %v950_v58 = vadd.f32 %v1615_v5, %v692_v47  ;;  %v951_v59 = vadd.f32 %v1615_v5, %v693_v48  ;;  %v697_v60 = vmul.f32 %v1610_v1, %v439_v44  ;;  %1204 = vst [vmem:[%s1644_s25 + $0x778] sm:$0xff] %v948_v50 }
  0xd2   : > { %v952_v0 = vadd.f32 %v1615_v5, %v694_v51  ;;  %v953_v2 = vadd.f32 %v1615_v5, %v695_v52  ;;  %v954_v3 = vadd.f32 %v1615_v5, %v696_v53  ;;  %v698_v4 = vmul.f32 %v1610_v1, %v440_v49  ;;  %1205 = vst [vmem:[%s1644_s25 + $0x780] sm:$0xff] %v949_v57 }
  0xd3   : > { %1206 = vst [vmem:[%s1644_s25 + $0x788] sm:$0xff] %v950_v58  ;;  %1207 = vst [vmem:[%s1644_s25 + $0x790] sm:$0xff] %v951_v59  ;;  %v955_v7 = vadd.f32 %v1615_v5, %v697_v60  ;;  %v699_v8 = vmul.f32 %v1610_v1, %v441_v54  ;;  %v700_v9 = vmul.f32 %v1610_v1, %v442_v55 }
  0xd4   : > { %v701_v10 = vmul.f32 %v1610_v1, %v443_v56  ;;  %1208 = vst [vmem:[%s1644_s25 + $0x798] sm:$0xff] %v952_v0  ;;  %1209 = vst [vmem:[%s1644_s25 + $0x7a0] sm:$0xff] %v953_v2  ;;  %v956_v12 = vadd.f32 %v1615_v5, %v698_v4  ;;  %v702_v13 = vmul.f32 %v1610_v1, %v444_v61 }
  0xd5   : > { %1210 = vst [vmem:[%s1644_s25 + $0x7a8] sm:$0xff] %v954_v3  ;;  %v703_v14 = vmul.f32 %v1610_v1, %v445_v62  ;;  %v704_v15 = vmul.f32 %v1610_v1, %v446_v63  ;;  %1211 = vst [vmem:[%s1644_s25 + $0x7b0] sm:$0xff] %v955_v7  ;;  %v957_v16 = vadd.f32 %v1615_v5, %v699_v8 }
  0xd6   : > { %v958_v17 = vadd.f32 %v1615_v5, %v700_v9  ;;  %v959_v18 = vadd.f32 %v1615_v5, %v701_v10  ;;  %v705_v19 = vmul.f32 %v1610_v1, %v447_v6  ;;  %1212 = vst [vmem:[%s1644_s25 + $0x7b8] sm:$0xff] %v956_v12  ;;  %v960_v20 = vadd.f32 %v1615_v5, %v702_v13 }
  0xd7   : > { %v961_v21 = vadd.f32 %v1615_v5, %v703_v14  ;;  %v962_v22 = vadd.f32 %v1615_v5, %v704_v15  ;;  %v706_v23 = vmul.f32 %v1610_v1, %v448_v11  ;;  %1213 = vst [vmem:[%s1644_s25 + $0x7c0] sm:$0xff] %v957_v16 }
  0xd8   : > { %1214 = vst [vmem:[%s1644_s25 + $0x7c8] sm:$0xff] %v958_v17  ;;  %1215 = vst [vmem:[%s1644_s25 + $0x7d0] sm:$0xff] %v959_v18  ;;  %v963_v24 = vadd.f32 %v1615_v5, %v705_v19 }
  0xd9   : > { %1216 = vst [vmem:[%s1644_s25 + $0x7d8] sm:$0xff] %v960_v20  ;;  %1217 = vst [vmem:[%s1644_s25 + $0x7e0] sm:$0xff] %v961_v21  ;;  %v964_v1 = vadd.f32 %v1615_v5, %v706_v23 }
  0xda   : > { %1218 = vst [vmem:[%s1644_s25 + $0x7e8] sm:$0xff] %v962_v22  ;;  %1219 = vst [vmem:[%s1644_s25 + $0x7f0] sm:$0xff] %v963_v24 }
  0xdb   : > { %1220 = vst [vmem:[%s1644_s25 + $0x7f8] sm:$0xff] %v964_v1 }
  0xdc   : > { %1415 = shalt.err (!%p1412_p10)
}
  0xdd   : > { %s1416_s24 = scalar_lea.hbm %s2640_s13, 32768  ;;  %s1420_s30 = scalar_lea.hbm %s2694_s3, 65536 }
  0xde   : > { %p1417_p0 = scmp.ne.s32.totalorder %s2640_s13, %s1416_s24  ;;  %p1421_p1 = scmp.lt.s32.totalorder %s2640_s13, %s2694_s3 }
  0xdf   : > { %p1422_p3 = scmp.lt.s32.totalorder %s1420_s30, %s1416_s24 }
  0xe0   : > { %p1418_p2 = pnand %p1417_p0, %p2703_p12 }
  0xe1   : > { %p1423_p6 = por %p1422_p3, %p1421_p1 }
  0xe2   : > { %p1419_p9 = pneg %p1418_p2 }
  0xe4   : > { %p1424_p11 = pnand %p1423_p6, %p1419_p9 }
  0xe6   : > { %1427 = shalt.err (!%p1424_p11)
}
  0xe7   : > { %s1472_s11 = smov 128   ;;  %s1473_s6 = smov 8  }
  0xe8   : > { %1326 = dma.vmem_to_hbm [thread:$0]  (%p2703_p12), %s2642_s10, 32768, %s2640_s13, %s1222_s14, %s1472_s11, %s1472_s11, %s1473_s6  }
  0xe9 PF: > { %s1250_s8 = sand.u32 1, %s1454_s16   ;;  %p2704_p13 = scmp.ne.s32.totalorder %s2700_s27, 0 }
  0xea   : > { %p2705_p4 = scmp.ge.s32.totalorder %s1466_s19, 2  ;;  %s1251_s25 = scalar_lea.sflag [#allocation6], %s1250_s8 }
  0xec   : > { %p1333_p5 = pnand %p2705_p4, %p2704_p13 }
  0xee   : > { %p1334_p7 = pneg %p1333_p5 }
  0xf0   : > { %1449 = dma.done.wait (%p1334_p7), %s1251_s25, 32768  }
  0xf1   : > { %1451 = vsyncadd (%p1334_p7), %s1251_s25, 4294934528  ;;  %p18_p8 = scmp.ge.s32.totalorder %s1525_s20, 4   ;;  %s2706_s16 = smov %s1458_s17 }
  0xf2   : > { %s2707_s17 = smov %s1462_s18  ;;  %s2708_s18 = smov %s1537_s23 }
  0xf3   : > { %s2709_s19 = smov %s1525_s20  ;;  %20 = sbr.rel (!%p18_p8) target bundleno = 8 (0x8), region = 77 }
  0xf8   :  { %1256 = vsyncpa [#allocation5], 1 }
  0xf9   :  { %1258 = vsyncpa [#allocation5 + $0x1], 1 }
  0xfa   :  { %1259 = vsyncpa [#allocation6], 1 }
  0xfb   :  { %1261 = vsyncpa [#allocation6 + $0x1], 1 }

</bundles_post_ra>
